<compile_context>
chip_gen: v7x
topology: tpu7x:2x2x1
jax: 0.10.0
libtpu: 0.0.40
codegen_flags: <defaults>
</compile_context>

<pallas_src>
import functools

import numpy as np

import jax
import jax.numpy as jnp
from jax import lax
from jax.experimental import pallas as pl
from jax.experimental.pallas import tpu as pltpu


_VMEM = pl.BlockSpec(memory_space=pltpu.MemorySpace.VMEM)

# MXU operand dtype (f32 accumulation via preferred_element_type, f32 epilogue).
MATMUL_DTYPE = jnp.bfloat16

NUM_CLASSES = 10

CONFIG = {
    "model": {
        "channels": [8, 16, 32],
        "num_blocks": [1, 1, 1],
        "use_bottleneck": False,
        "use_depthwise": False,
        "squeeze_and_excitation": False,
        "use_dropout": False,
    }
}


def _mxu_dot(a, b):
    # b (the banded weight) is already MATMUL_DTYPE from init; only the
    # activation operand pays a (cheap) VPU cast here.
    return jnp.dot(a.astype(MATMUL_DTYPE), b.astype(MATMUL_DTYPE),
                   preferred_element_type=jnp.float32)


def _default_fuse_proj():
    """Fuse conv1 + projection into one N=256 matmul on 256-wide-MXU chips
    (v6e/v7x); keep them separate on v5e (128-wide MXU)."""
    try:
        kind = jax.devices()[0].device_kind.lower()
    except Exception:
        return True
    return "v5" not in kind


# ------------------------- static network plan ----------------------------- #

def _stage_plan(config, height, width):
    channels = config["model"]["channels"]
    num_blocks = config["model"]["num_blocks"]
    plan = []
    in_c, h, w = channels[0], height, width
    for stage, (out_c, nb) in enumerate(zip(channels, num_blocks)):
        for b in range(nb):
            stride = (1 if stage == 0 else 2) if b == 0 else 1
            plan.append(dict(in_c=in_c, out_c=out_c, stride=stride,
                             h_in=h, w_in=w, h_out=h // stride, w_out=w // stride,
                             use_projection=(in_c != out_c)))
            in_c, h, w = out_c, h // stride, w // stride
    return plan


def _pad_shapes(plan, batch, height, width, c0_pad):
    """Unique shapes of the zero-haloed VMEM scratches (one per (H+2, W*C))."""
    shapes = [(batch, height + 2, width * c0_pad)]
    for blk in plan:
        shapes.append((batch, blk["h_in"] + 2, blk["w_in"] * blk["in_c"]))
        shapes.append((batch, blk["h_out"] + 2, blk["w_out"] * blk["out_c"]))
    uniq = []
    for s in shapes:
        if s not in uniq:
            uniq.append(s)
    return uniq


# ---------------------- weight preprocessing (init time) ------------------- #

def _conv3x3_band3(w_hwio, w_in, stride, cin_pad=None):
    """Per-ky banded im2col weight slabs: [3, w_in*cp, (w_in//stride)*cout].

    Slab ky, row (xi*cp + ci), column (xo*cout + co) holds w[ky, kx, ci, co]
    with kx = xi - xo*stride + 1 when that tap is in range.  kx taps falling
    outside [0, w_in) are zero rows, so no W padding of the activation is ever
    needed; the W-direction stride is also absorbed here.
    """
    _, _, cin, cout = w_hwio.shape
    cp = cin if cin_pad is None else cin_pad
    w_out = w_in // stride
    band = np.zeros((3, w_in * cp, w_out * cout), np.float32)
    for ky in range(3):
        for xo in range(w_out):
            for kx in range(3):
                xi = xo * stride + kx - 1
                if 0 <= xi < w_in:
                    band[ky, xi * cp:xi * cp + cin,
                         xo * cout:(xo + 1) * cout] = w_hwio[ky, kx]
    return band


def _conv1x1_band(w_io, w_in, stride):
    """1x1 (projection) conv as a banded matrix in the [.., W*C] lane layout."""
    cin, cout = w_io.shape
    w_out = w_in // stride
    band = np.zeros((w_in * cin, w_out * cout), np.float32)
    for xo in range(w_out):
        xi = xo * stride
        band[xi * cin:(xi + 1) * cin, xo * cout:(xo + 1) * cout] = w_io
    return band


def _fused_conv_proj_band3(w3_hwio, wproj_io, w_in, stride):
    """conv1 (3x3) + 1x1 projection fused into one [3, K, 2*N] band.

    The projection only needs the center input row (ky=1 tap), so its band is
    packed into the ky=1 slab's right half; ky=0/2 right halves stay zero.
    """
    b3 = _conv3x3_band3(w3_hwio, w_in, stride)           # (3, K, N)
    bp = _conv1x1_band(wproj_io, w_in, stride)           # (K, N)
    _, K, N = b3.shape
    out = np.zeros((3, K, 2 * N), np.float32)
    out[:, :, :N] = b3
    out[1, :, N:] = bp
    return out


def _flat_bn(vec_c, w_out):
    """Per-channel BN scale/bias -> per-lane row vector for the [.., W*C] layout."""
    return np.tile(np.asarray(vec_c, np.float32), w_out)[None, :]


# -------------------------- parameter initialization ----------------------- #

def _fold_bn_params(key, c, eps=1e-5):
    k1, k2, k3, k4 = jax.random.split(key, 4)
    gamma = 1.0 + 0.1 * jax.random.normal(k1, (c,), jnp.float32)
    beta = 0.1 * jax.random.normal(k2, (c,), jnp.float32)
    mean = 0.05 * jax.random.normal(k3, (c,), jnp.float32)
    var = 1.0 + 0.1 * jax.random.uniform(k4, (c,), jnp.float32)
    scale = gamma / jnp.sqrt(var + eps)
    bias = beta - mean * scale
    return np.asarray(scale, np.float32), np.asarray(bias, np.float32)


def _init_conv3x3(key, cin, cout):
    std = (2.0 / (9 * cin)) ** 0.5
    return np.asarray(std * jax.random.normal(key, (3, 3, cin, cout), jnp.float32))


def _init_conv1x1(key, cin, cout):
    std = (2.0 / cin) ** 0.5
    return np.asarray(std * jax.random.normal(key, (cin, cout), jnp.float32))


def init_model(key, config, input_hw=(16, 16), fuse_conv1_proj=None):
    mcfg = config["model"]
    # TODO(synk): bottleneck / depthwise / squeeze-and-excitation / dropout paths
    # are disabled by this config and are not implemented in the fused kernel.
    assert not mcfg.get("use_bottleneck", False)
    assert not mcfg.get("use_depthwise", False)
    assert not mcfg.get("squeeze_and_excitation", False)
    assert not mcfg.get("use_dropout", False)
    if fuse_conv1_proj is None:
        fuse_conv1_proj = _default_fuse_proj()

    h, w = input_hw
    channels = mcfg["channels"]
    plan = _stage_plan(config, h, w)
    c0 = channels[0]
    c0_pad = max(3, c0)  # pad the 3 RGB channels so the stem is lane-dense too

    keys = iter(jax.random.split(key, 4 + 6 * len(plan)))

    stem_w = _init_conv3x3(next(keys), 3, c0)
    stem_scale, stem_bias = _fold_bn_params(next(keys), c0)
    params = {
        "plan": plan,
        "input_hw": (h, w),
        "c0_pad": c0_pad,
        "fuse_conv1_proj": fuse_conv1_proj,
        "stem": {
            "w": jnp.asarray(stem_w),
            "bn": (jnp.asarray(stem_scale), jnp.asarray(stem_bias)),
            "band": jnp.asarray(_conv3x3_band3(stem_w, w, 1, cin_pad=c0_pad),
                                dtype=MATMUL_DTYPE),
            "scale": jnp.asarray(_flat_bn(stem_scale, w)),
            "bias": jnp.asarray(_flat_bn(stem_bias, w)),
        },
    }

    blocks = []
    for blk in plan:
        cin, cout, s = blk["in_c"], blk["out_c"], blk["stride"]
        w_in, w_out = blk["w_in"], blk["w_out"]
        w1 = _init_conv3x3(next(keys), cin, cout)
        bn1 = _fold_bn_params(next(keys), cout)
        w2 = _init_conv3x3(next(keys), cout, cout)
        bn2 = _fold_bn_params(next(keys), cout)
        entry = {
            "stride": s,
            "use_projection": blk["use_projection"],
            "conv1_w": jnp.asarray(w1),
            "bn1": (jnp.asarray(bn1[0]), jnp.asarray(bn1[1])),
            "conv2_w": jnp.asarray(w2),
            "bn2": (jnp.asarray(bn2[0]), jnp.asarray(bn2[1])),
            "conv2_band": jnp.asarray(_conv3x3_band3(w2, w_out, 1), dtype=MATMUL_DTYPE),
            "conv2_scale": jnp.asarray(_flat_bn(bn2[0], w_out)),
            "conv2_bias": jnp.asarray(_flat_bn(bn2[1], w_out)),
        }
        if blk["use_projection"]:
            pw = _init_conv1x1(next(keys), cin, cout)
            pbn = _fold_bn_params(next(keys), cout)
            entry["proj_w"] = jnp.asarray(pw)
            entry["proj_bn"] = (jnp.asarray(pbn[0]), jnp.asarray(pbn[1]))
            if fuse_conv1_proj:
                # conv1 + projection share one N=2*128 band (fills 256-wide MXU).
                entry["conv1_band"] = jnp.asarray(
                    _fused_conv_proj_band3(w1, pw, w_in, s), dtype=MATMUL_DTYPE)
                entry["conv1_scale"] = jnp.asarray(np.concatenate(
                    [_flat_bn(bn1[0], w_out), _flat_bn(pbn[0], w_out)], axis=-1))
                entry["conv1_bias"] = jnp.asarray(np.concatenate(
                    [_flat_bn(bn1[1], w_out), _flat_bn(pbn[1], w_out)], axis=-1))
            else:
                entry["conv1_band"] = jnp.asarray(_conv3x3_band3(w1, w_in, s),
                                                  dtype=MATMUL_DTYPE)
                entry["conv1_scale"] = jnp.asarray(_flat_bn(bn1[0], w_out))
                entry["conv1_bias"] = jnp.asarray(_flat_bn(bn1[1], w_out))
                entry["proj_band"] = jnp.asarray(_conv1x1_band(pw, w_in, s),
                                                 dtype=MATMUL_DTYPE)
                entry["proj_scale"] = jnp.asarray(_flat_bn(pbn[0], w_out))
                entry["proj_bias"] = jnp.asarray(_flat_bn(pbn[1], w_out))
        else:
            entry["conv1_band"] = jnp.asarray(_conv3x3_band3(w1, w_in, s),
                                              dtype=MATMUL_DTYPE)
            entry["conv1_scale"] = jnp.asarray(_flat_bn(bn1[0], w_out))
            entry["conv1_bias"] = jnp.asarray(_flat_bn(bn1[1], w_out))
        blocks.append(entry)
    params["blocks"] = blocks

    c_final = plan[-1]["out_c"]
    h_f, w_f = plan[-1]["h_out"], plan[-1]["w_out"]
    fc_w = np.asarray((1.0 / np.sqrt(c_final)) *
                      jax.random.normal(next(keys), (c_final, NUM_CLASSES), jnp.float32))
    fc_b = np.asarray((1.0 / np.sqrt(c_final)) *
                      jax.random.normal(next(keys), (NUM_CLASSES,), jnp.float32))
    params["fc_w"] = jnp.asarray(fc_w)
    params["fc_b"] = jnp.asarray(fc_b)
    # Average pool (lane index = x*C + c) and the 1/(H*W) factor folded into the
    # FC weight: logits = sum_h(act) @ fc_w_eff + b.  Kept f32 (one tiny dot).
    params["fc_w_eff"] = jnp.asarray(np.tile(fc_w, (w_f, 1)) / float(h_f * w_f))
    params["fc_b_row"] = jnp.asarray(fc_b[None, :])
    return params


# ------------------------------ fused kernel ------------------------------- #

def _make_kernel(plan, batch, stem_h, n_in, pad_shapes, fuse_proj):
    pad_index = {s: i for i, s in enumerate(pad_shapes)}

    def kernel(*refs):
        in_refs, o_ref, pads = refs[:n_in], refs[n_in], refs[n_in + 1:]
        it = iter(in_refs)

        def nxt():
            return next(it)

        # Zero ONLY the two halo rows of each shared scratch: interior rows
        # [1 : h+1] are fully overwritten by every conv that uses the scratch,
        # so the halo rows alone provide the padding=1 zeros.
        for p in pads:
            hh = p.shape[1] - 2
            zrow = jnp.zeros((p.shape[0], 1, p.shape[2]), p.dtype)
            p[:, 0:1, :] = zrow
            p[:, hh + 1:hh + 2, :] = zrow

        def conv3x3_bn(a, h_in, stride, band, scale, bias):
            """3x3 conv (pad=1, H/W stride folded in) + folded BN.
            Returns [B, h_out, N] in f32."""
            lanes = a.shape[-1]
            h_out = h_in // stride
            n_out = band.shape[-1]
            p = pads[pad_index[(batch, h_in + 2, lanes)]]
            p[:, 1:h_in + 1, :] = a                      # in-kernel H padding
            acc = None
            for ky in range(3):
                # Three lane-aligned ky taps sliding along the sublane (H) axis;
                # the H stride is folded into the tap slice, the kx taps /
                # W padding / W stride live in the banded weight slabs.
                if stride == 1:
                    tap = p[:, ky:ky + h_in, :]
                else:
                    tap = p[:, pl.ds(ky, h_out, stride=stride), :]
                d = _mxu_dot(tap.reshape(batch * h_out, lanes), band[ky])
                acc = d if acc is None else acc + d
            y = acc * scale[...] + bias[...]             # folded BatchNorm (f32)
            return y.reshape(batch, h_out, n_out)

        def proj1x1_bn(h_in, stride, lanes, band, scale, bias):
            """1x1 projection + BN (non-fused path): reads the ky=1 (center)
            rows of the scratch conv1 just filled with this block's input."""
            h_out = h_in // stride
            p = pads[pad_index[(batch, h_in + 2, lanes)]]
            if stride == 1:
                tap = p[:, 1:1 + h_in, :]
            else:
                tap = p[:, pl.ds(1, h_out, stride=stride), :]
            y = _mxu_dot(tap.reshape(batch * h_out, lanes), band[...])
            y = y * scale[...] + bias[...]
            return y.reshape(batch, h_out, band.shape[-1])

        a = nxt()[...]                                   # input, [B, H, W*C0] f32
        a = jnp.maximum(conv3x3_bn(a, stem_h, 1, nxt(), nxt(), nxt()), 0.0)  # stem

        for blk in plan:
            h_in, h_out, s = blk["h_in"], blk["h_out"], blk["stride"]
            lanes_in = blk["w_in"] * blk["in_c"]
            band1, sc1, bi1 = nxt(), nxt(), nxt()
            band2, sc2, bi2 = nxt(), nxt(), nxt()
            fused = blk["use_projection"] and fuse_proj
            prj = None
            if blk["use_projection"] and not fuse_proj:
                prj = (nxt(), nxt(), nxt())

            identity = a
            y = conv3x3_bn(a, h_in, s, band1, sc1, bi1)  # conv1 (+proj if fused)
            if fused:
                half = y.shape[-1] // 2
                identity = y[..., half:]                 # projection branch (BN'd)
                y = y[..., :half]
            elif prj is not None:
                identity = proj1x1_bn(h_in, s, lanes_in, *prj)
            y = jnp.maximum(y, 0.0)                      # ReLU after bn1
            out = conv3x3_bn(y, h_out, 1, band2, sc2, bi2)
            a = jnp.maximum(out + identity, 0.0)         # residual add + ReLU (f32)

        fc_w, fc_b = nxt(), nxt()
        # Global average pool + FC (pool matrix and 1/(H*W) folded into fc_w).
        pooled_sum = jnp.sum(a, axis=1)                  # [B, Wf*Cf], f32
        logits = jnp.dot(pooled_sum, fc_w[...],
                         preferred_element_type=jnp.float32) + fc_b[...]
        o_ref[...] = logits.astype(o_ref.dtype)

    return kernel


# --------------------------------- forward --------------------------------- #

def efficient_resnet_forward(params, x_nchw, core_split=1):
    """Fused forward pass.  core_split > 1 (v7x) shards the batch across
    TensorCores with a parallel grid axis; requires (batch/core_split) % 8 == 0."""
    plan = params["plan"]
    h, w = params["input_hw"]
    c0_pad = params["c0_pad"]
    fuse = params["fuse_conv1_proj"]
    batch, cin = x_nchw.shape[0], x_nchw.shape[1]
    assert x_nchw.shape[2] == h and x_nchw.shape[3] == w

    # NCHW -> lane-dense [B, H, W*C]; zero-pad the RGB channels up to channels[0]
    # so the stem uses the same 128-lane layout.
    x = jnp.transpose(x_nchw, (0, 2, 3, 1)).astype(jnp.float32)
    if c0_pad > cin:
        x = jnp.concatenate(
            [x, jnp.zeros((batch, h, w, c0_pad - cin), x.dtype)], axis=-1)
    x = x.reshape(batch, h, w * c0_pad)

    flat_inputs = [x, params["stem"]["band"], params["stem"]["scale"],
                   params["stem"]["bias"]]
    for bp in params["blocks"]:
        flat_inputs += [bp["conv1_band"], bp["conv1_scale"], bp["conv1_bias"],
                        bp["conv2_band"], bp["conv2_scale"], bp["conv2_bias"]]
        if bp["use_projection"] and not fuse:
            flat_inputs += [bp["proj_band"], bp["proj_scale"], bp["proj_bias"]]
    flat_inputs += [params["fc_w_eff"], params["fc_b_row"]]
    n_in = len(flat_inputs)

    if core_split > 1:
        assert batch % core_split == 0
        bpc = batch // core_split
        assert bpc % 8 == 0, ("per-core batch must be a multiple of 8 so the "
                              "(bpc, 10) output block satisfies the (8,128) rule")
    else:
        bpc = batch

    pad_shapes = _pad_shapes(plan, bpc, h, w, c0_pad)
    kernel = _make_kernel(plan, bpc, h, n_in, pad_shapes, fuse)
    scratch = [pltpu.VMEM(s, jnp.float32) for s in pad_shapes]
    out_shape = jax.ShapeDtypeStruct((batch, NUM_CLASSES), jnp.float32)

    if core_split == 1:
        # Grid-less: total resident VMEM (weights + scratch + activations) is a
        # couple of MiB, far below the scoped-VMEM default on all generations.
        return pl.pallas_call(
            kernel,
            out_shape=out_shape,
            in_specs=[_VMEM] * n_in,
            out_specs=_VMEM,
            scratch_shapes=scratch,
        )(*flat_inputs)

    # v7x: parallel batch grid so both TensorCores are used.
    def _const_map(nd):
        return lambda i: (0,) * nd

    in_specs = [pl.BlockSpec((bpc, h, w * c0_pad), lambda i: (i, 0, 0))]
    in_specs += [pl.BlockSpec(a.shape, _const_map(a.ndim)) for a in flat_inputs[1:]]
    return pl.pallas_call(
        kernel,
        out_shape=out_shape,
        grid=(core_split,),
        in_specs=in_specs,
        out_specs=pl.BlockSpec((bpc, NUM_CLASSES), lambda i: (i, 0)),
        scratch_shapes=scratch,
        compiler_params=pltpu.CompilerParams(dimension_semantics=("parallel",)),
    )(*flat_inputs)


# --------------------------- pure-XLA reference ----------------------------- #

def reference_forward(params, x_nchw):
    """Plain-JAX reference mirroring the PyTorch module (eval-mode BN folded).

    Conv operands are cast to MATMUL_DTYPE with f32 accumulation, exactly like
    the kernel's MXU dots; BN / ReLU / residual / pool / FC stay f32, so the
    comparison against the Pallas kernel is tight.
    """
    def bn(y, sb):
        scale, bias = sb
        return y * scale[None, :, None, None] + bias[None, :, None, None]

    def conv3(x, w_hwio, stride):
        return lax.conv_general_dilated(
            x.astype(MATMUL_DTYPE), w_hwio.astype(MATMUL_DTYPE),
            (stride, stride), ((1, 1), (1, 1)),
            dimension_numbers=("NCHW", "HWIO", "NCHW"),
            preferred_element_type=jnp.float32)

    def conv1(x, w_io, stride):
        return lax.conv_general_dilated(
            x.astype(MATMUL_DTYPE), w_io[None, None].astype(MATMUL_DTYPE),
            (stride, stride), "VALID",
            dimension_numbers=("NCHW", "HWIO", "NCHW"),
            preferred_element_type=jnp.float32)

    out = jax.nn.relu(bn(conv3(x_nchw, params["stem"]["w"], 1), params["stem"]["bn"]))
    for blk in params["blocks"]:
        identity = out
        y = jax.nn.relu(bn(conv3(out, blk["conv1_w"], blk["stride"]), blk["bn1"]))
        y = bn(conv3(y, blk["conv2_w"], 1), blk["bn2"])
        if blk["use_projection"]:
            identity = bn(conv1(out, blk["proj_w"], blk["stride"]), blk["proj_bn"])
        out = jax.nn.relu(y + identity)
    pooled = jnp.mean(out, axis=(2, 3))
    return jnp.dot(pooled, params["fc_w"],
                   precision=lax.Precision.HIGHEST) + params["fc_b"]


if __name__ == "__main__":
    key = jax.random.PRNGKey(0)
    pkey, xkey = jax.random.split(key)
    params = init_model(pkey, CONFIG, input_hw=(16, 16))
    x = jax.random.normal(xkey, (2, 3, 16, 16), jnp.float32)   # NCHW, like PyTorch

    fwd = jax.jit(functools.partial(efficient_resnet_forward, params))
    logits = fwd(x)
    jax.block_until_ready(logits)
    assert logits.shape == (2, NUM_CLASSES) and logits.dtype == jnp.float32

    # Numerical check of the fused Pallas kernel against the XLA reference
    # (same bf16-operand / f32-accumulate matmul semantics).
    ref = reference_forward(params, x)
    np.testing.assert_allclose(np.asarray(logits), np.asarray(ref),
                               rtol=5e-3, atol=5e-3)
    print("KERNEL_OK")
</pallas_src>

<mosaic_0001>
module attributes {stable_mosaic.version = 11 : i64} {
  func.func @kernel(%arg0: memref<2x16x128xf32, #tpu.memory_space<vmem>>, %arg1: memref<3x128x128xbf16, #tpu.memory_space<vmem>>, %arg2: memref<1x128xf32, #tpu.memory_space<vmem>>, %arg3: memref<1x128xf32, #tpu.memory_space<vmem>>, %arg4: memref<3x128x128xbf16, #tpu.memory_space<vmem>>, %arg5: memref<1x128xf32, #tpu.memory_space<vmem>>, %arg6: memref<1x128xf32, #tpu.memory_space<vmem>>, %arg7: memref<3x128x128xbf16, #tpu.memory_space<vmem>>, %arg8: memref<1x128xf32, #tpu.memory_space<vmem>>, %arg9: memref<1x128xf32, #tpu.memory_space<vmem>>, %arg10: memref<3x128x256xbf16, #tpu.memory_space<vmem>>, %arg11: memref<1x256xf32, #tpu.memory_space<vmem>>, %arg12: memref<1x256xf32, #tpu.memory_space<vmem>>, %arg13: memref<3x128x128xbf16, #tpu.memory_space<vmem>>, %arg14: memref<1x128xf32, #tpu.memory_space<vmem>>, %arg15: memref<1x128xf32, #tpu.memory_space<vmem>>, %arg16: memref<3x128x256xbf16, #tpu.memory_space<vmem>>, %arg17: memref<1x256xf32, #tpu.memory_space<vmem>>, %arg18: memref<1x256xf32, #tpu.memory_space<vmem>>, %arg19: memref<3x128x128xbf16, #tpu.memory_space<vmem>>, %arg20: memref<1x128xf32, #tpu.memory_space<vmem>>, %arg21: memref<1x128xf32, #tpu.memory_space<vmem>>, %arg22: memref<128x10xf32, #tpu.memory_space<vmem>>, %arg23: memref<1x10xf32, #tpu.memory_space<vmem>>, %arg24: memref<2x10xf32, #tpu.memory_space<vmem>>, %arg25: memref<2x18x128xf32, #tpu.memory_space<vmem>>, %arg26: memref<2x10x128xf32, #tpu.memory_space<vmem>>, %arg27: memref<2x6x128xf32, #tpu.memory_space<vmem>>) attributes {dimension_semantics = [], scalar_prefetch = 0 : i64, scratch_operands = 3 : i64, tpu.core_type = #tpu.core_type<tc>} {
    %cst = arith.constant 0.000000e+00 : f32
    %0 = vector.broadcast %cst : f32 to vector<2x1x128xf32>
    %c0 = arith.constant 0 : index
    %c0_0 = arith.constant 0 : index
    %c0_1 = arith.constant 0 : index
    %1 = vector.load %arg25[%c0, %c0_0, %c0_1] : memref<2x18x128xf32, #tpu.memory_space<vmem>>, vector<2x1x128xf32>
    tpu.vector_store %arg25[%c0, %c0_0, %c0_1], %0 {strides = array<i32>} : memref<2x18x128xf32, #tpu.memory_space<vmem>>, vector<2x1x128xf32>,
    %c0_2 = arith.constant 0 : index
    %c17 = arith.constant 17 : index
    %c0_3 = arith.constant 0 : index
    %2 = vector.load %arg25[%c0_2, %c17, %c0_3] : memref<2x18x128xf32, #tpu.memory_space<vmem>>, vector<2x1x128xf32>
    tpu.vector_store %arg25[%c0_2, %c17, %c0_3], %0 {strides = array<i32>} : memref<2x18x128xf32, #tpu.memory_space<vmem>>, vector<2x1x128xf32>,
    %cst_4 = arith.constant 0.000000e+00 : f32
    %3 = vector.broadcast %cst_4 : f32 to vector<2x1x128xf32>
    %c0_5 = arith.constant 0 : index
    %c0_6 = arith.constant 0 : index
    %c0_7 = arith.constant 0 : index
    %4 = vector.load %arg26[%c0_5, %c0_6, %c0_7] : memref<2x10x128xf32, #tpu.memory_space<vmem>>, vector<2x1x128xf32>
    tpu.vector_store %arg26[%c0_5, %c0_6, %c0_7], %3 {strides = array<i32>} : memref<2x10x128xf32, #tpu.memory_space<vmem>>, vector<2x1x128xf32>,
    %c0_8 = arith.constant 0 : index
    %c9 = arith.constant 9 : index
    %c0_9 = arith.constant 0 : index
    %5 = vector.load %arg26[%c0_8, %c9, %c0_9] : memref<2x10x128xf32, #tpu.memory_space<vmem>>, vector<2x1x128xf32>
    tpu.vector_store %arg26[%c0_8, %c9, %c0_9], %3 {strides = array<i32>} : memref<2x10x128xf32, #tpu.memory_space<vmem>>, vector<2x1x128xf32>,
    %cst_10 = arith.constant 0.000000e+00 : f32
    %6 = vector.broadcast %cst_10 : f32 to vector<2x1x128xf32>
    %c0_11 = arith.constant 0 : index
    %c0_12 = arith.constant 0 : index
    %c0_13 = arith.constant 0 : index
    %7 = vector.load %arg27[%c0_11, %c0_12, %c0_13] : memref<2x6x128xf32, #tpu.memory_space<vmem>>, vector<2x1x128xf32>
    tpu.vector_store %arg27[%c0_11, %c0_12, %c0_13], %6 {strides = array<i32>} : memref<2x6x128xf32, #tpu.memory_space<vmem>>, vector<2x1x128xf32>,
    %c0_14 = arith.constant 0 : index
    %c5 = arith.constant 5 : index
    %c0_15 = arith.constant 0 : index
    %8 = vector.load %arg27[%c0_14, %c5, %c0_15] : memref<2x6x128xf32, #tpu.memory_space<vmem>>, vector<2x1x128xf32>
    tpu.vector_store %arg27[%c0_14, %c5, %c0_15], %6 {strides = array<i32>} : memref<2x6x128xf32, #tpu.memory_space<vmem>>, vector<2x1x128xf32>,
    %c0_16 = arith.constant 0 : index
    %c0_17 = arith.constant 0 : index
    %c0_18 = arith.constant 0 : index
    %9 = vector.load %arg0[%c0_16, %c0_17, %c0_18] : memref<2x16x128xf32, #tpu.memory_space<vmem>>, vector<2x16x128xf32>
    %c0_19 = arith.constant 0 : index
    %c1 = arith.constant 1 : index
    %c0_20 = arith.constant 0 : index
    %10 = vector.load %arg25[%c0_19, %c1, %c0_20] : memref<2x18x128xf32, #tpu.memory_space<vmem>>, vector<2x16x128xf32>
    tpu.vector_store %arg25[%c0_19, %c1, %c0_20], %9 {strides = array<i32>} : memref<2x18x128xf32, #tpu.memory_space<vmem>>, vector<2x16x128xf32>,
    %c0_21 = arith.constant 0 : index
    %c0_22 = arith.constant 0 : index
    %c0_23 = arith.constant 0 : index
    %11 = vector.load %arg25[%c0_21, %c0_22, %c0_23] : memref<2x18x128xf32, #tpu.memory_space<vmem>>, vector<2x16x128xf32>
    %12 = vector.shape_cast %11 : vector<2x16x128xf32> to vector<32x128xf32>
    %c0_24 = arith.constant 0 : index
    %c0_25 = arith.constant 0 : index
    %c0_26 = arith.constant 0 : index
    %13 = vector.load %arg1[%c0_24, %c0_25, %c0_26] : memref<3x128x128xbf16, #tpu.memory_space<vmem>>, vector<1x128x128xbf16>
    %14 = vector.shape_cast %13 : vector<1x128x128xbf16> to vector<128x128xbf16>
    %15 = arith.truncf %12 : vector<32x128xf32> to vector<32x128xbf16>
    %cst_27 = arith.constant dense<0.000000e+00> : vector<32x128xf32>
    %16 = tpu.matmul %15, %14, %cst_27 {dimension_numbers = #tpu.dot_dimension_numbers<[1], [0], [0], [1], [0, 0, 1, 1], [], []>} : vector<32x128xbf16>, vector<128x128xbf16>, vector<32x128xf32> -> vector<32x128xf32>
    %c0_28 = arith.constant 0 : index
    %c1_29 = arith.constant 1 : index
    %c0_30 = arith.constant 0 : index
    %17 = vector.load %arg25[%c0_28, %c1_29, %c0_30] : memref<2x18x128xf32, #tpu.memory_space<vmem>>, vector<2x16x128xf32>
    %18 = vector.shape_cast %17 : vector<2x16x128xf32> to vector<32x128xf32>
    %c1_31 = arith.constant 1 : index
    %c0_32 = arith.constant 0 : index
    %c0_33 = arith.constant 0 : index
    %19 = vector.load %arg1[%c1_31, %c0_32, %c0_33] : memref<3x128x128xbf16, #tpu.memory_space<vmem>>, vector<1x128x128xbf16>
    %20 = vector.shape_cast %19 : vector<1x128x128xbf16> to vector<128x128xbf16>
    %21 = arith.truncf %18 : vector<32x128xf32> to vector<32x128xbf16>
    %cst_34 = arith.constant dense<0.000000e+00> : vector<32x128xf32>
    %22 = tpu.matmul %21, %20, %cst_34 {dimension_numbers = #tpu.dot_dimension_numbers<[1], [0], [0], [1], [0, 0, 1, 1], [], []>} : vector<32x128xbf16>, vector<128x128xbf16>, vector<32x128xf32> -> vector<32x128xf32>
    %23 = arith.addf %16, %22 : vector<32x128xf32>
    %c0_35 = arith.constant 0 : index
    %c2 = arith.constant 2 : index
    %c0_36 = arith.constant 0 : index
    %24 = vector.load %arg25[%c0_35, %c2, %c0_36] : memref<2x18x128xf32, #tpu.memory_space<vmem>>, vector<2x16x128xf32>
    %25 = vector.shape_cast %24 : vector<2x16x128xf32> to vector<32x128xf32>
    %c2_37 = arith.constant 2 : index
    %c0_38 = arith.constant 0 : index
    %c0_39 = arith.constant 0 : index
    %26 = vector.load %arg1[%c2_37, %c0_38, %c0_39] : memref<3x128x128xbf16, #tpu.memory_space<vmem>>, vector<1x128x128xbf16>
    %27 = vector.shape_cast %26 : vector<1x128x128xbf16> to vector<128x128xbf16>
    %28 = arith.truncf %25 : vector<32x128xf32> to vector<32x128xbf16>
    %cst_40 = arith.constant dense<0.000000e+00> : vector<32x128xf32>
    %29 = tpu.matmul %28, %27, %cst_40 {dimension_numbers = #tpu.dot_dimension_numbers<[1], [0], [0], [1], [0, 0, 1, 1], [], []>} : vector<32x128xbf16>, vector<128x128xbf16>, vector<32x128xf32> -> vector<32x128xf32>
    %30 = arith.addf %23, %29 : vector<32x128xf32>
    %c0_41 = arith.constant 0 : index
    %c0_42 = arith.constant 0 : index
    %31 = vector.load %arg2[%c0_41, %c0_42] : memref<1x128xf32, #tpu.memory_space<vmem>>, vector<1x128xf32>
    %32 = vector.broadcast %31 : vector<1x128xf32> to vector<32x128xf32>
    %33 = arith.mulf %30, %32 : vector<32x128xf32>
    %c0_43 = arith.constant 0 : index
    %c0_44 = arith.constant 0 : index
    %34 = vector.load %arg3[%c0_43, %c0_44] : memref<1x128xf32, #tpu.memory_space<vmem>>, vector<1x128xf32>
    %35 = vector.broadcast %34 : vector<1x128xf32> to vector<32x128xf32>
    %36 = arith.addf %33, %35 : vector<32x128xf32>
    %37 = vector.shape_cast %36 : vector<32x128xf32> to vector<2x16x128xf32>
    %cst_45 = arith.constant 0.000000e+00 : f32
    %38 = vector.broadcast %cst_45 : f32 to vector<2x16x128xf32>
    %39 = arith.maximumf %37, %38 : vector<2x16x128xf32>
    %c0_46 = arith.constant 0 : index
    %c1_47 = arith.constant 1 : index
    %c0_48 = arith.constant 0 : index
    %40 = vector.load %arg25[%c0_46, %c1_47, %c0_48] : memref<2x18x128xf32, #tpu.memory_space<vmem>>, vector<2x16x128xf32>
    tpu.vector_store %arg25[%c0_46, %c1_47, %c0_48], %39 {strides = array<i32>} : memref<2x18x128xf32, #tpu.memory_space<vmem>>, vector<2x16x128xf32>,
    %c0_49 = arith.constant 0 : index
    %c0_50 = arith.constant 0 : index
    %c0_51 = arith.constant 0 : index
    %41 = vector.load %arg25[%c0_49, %c0_50, %c0_51] : memref<2x18x128xf32, #tpu.memory_space<vmem>>, vector<2x16x128xf32>
    %42 = vector.shape_cast %41 : vector<2x16x128xf32> to vector<32x128xf32>
    %c0_52 = arith.constant 0 : index
    %c0_53 = arith.constant 0 : index
    %c0_54 = arith.constant 0 : index
    %43 = vector.load %arg4[%c0_52, %c0_53, %c0_54] : memref<3x128x128xbf16, #tpu.memory_space<vmem>>, vector<1x128x128xbf16>
    %44 = vector.shape_cast %43 : vector<1x128x128xbf16> to vector<128x128xbf16>
    %45 = arith.truncf %42 : vector<32x128xf32> to vector<32x128xbf16>
    %cst_55 = arith.constant dense<0.000000e+00> : vector<32x128xf32>
    %46 = tpu.matmul %45, %44, %cst_55 {dimension_numbers = #tpu.dot_dimension_numbers<[1], [0], [0], [1], [0, 0, 1, 1], [], []>} : vector<32x128xbf16>, vector<128x128xbf16>, vector<32x128xf32> -> vector<32x128xf32>
    %c0_56 = arith.constant 0 : index
    %c1_57 = arith.constant 1 : index
    %c0_58 = arith.constant 0 : index
    %47 = vector.load %arg25[%c0_56, %c1_57, %c0_58] : memref<2x18x128xf32, #tpu.memory_space<vmem>>, vector<2x16x128xf32>
    %48 = vector.shape_cast %47 : vector<2x16x128xf32> to vector<32x128xf32>
    %c1_59 = arith.constant 1 : index
    %c0_60 = arith.constant 0 : index
    %c0_61 = arith.constant 0 : index
    %49 = vector.load %arg4[%c1_59, %c0_60, %c0_61] : memref<3x128x128xbf16, #tpu.memory_space<vmem>>, vector<1x128x128xbf16>
    %50 = vector.shape_cast %49 : vector<1x128x128xbf16> to vector<128x128xbf16>
    %51 = arith.truncf %48 : vector<32x128xf32> to vector<32x128xbf16>
    %cst_62 = arith.constant dense<0.000000e+00> : vector<32x128xf32>
    %52 = tpu.matmul %51, %50, %cst_62 {dimension_numbers = #tpu.dot_dimension_numbers<[1], [0], [0], [1], [0, 0, 1, 1], [], []>} : vector<32x128xbf16>, vector<128x128xbf16>, vector<32x128xf32> -> vector<32x128xf32>
    %53 = arith.addf %46, %52 : vector<32x128xf32>
    %c0_63 = arith.constant 0 : index
    %c2_64 = arith.constant 2 : index
    %c0_65 = arith.constant 0 : index
    %54 = vector.load %arg25[%c0_63, %c2_64, %c0_65] : memref<2x18x128xf32, #tpu.memory_space<vmem>>, vector<2x16x128xf32>
    %55 = vector.shape_cast %54 : vector<2x16x128xf32> to vector<32x128xf32>
    %c2_66 = arith.constant 2 : index
    %c0_67 = arith.constant 0 : index
    %c0_68 = arith.constant 0 : index
    %56 = vector.load %arg4[%c2_66, %c0_67, %c0_68] : memref<3x128x128xbf16, #tpu.memory_space<vmem>>, vector<1x128x128xbf16>
    %57 = vector.shape_cast %56 : vector<1x128x128xbf16> to vector<128x128xbf16>
    %58 = arith.truncf %55 : vector<32x128xf32> to vector<32x128xbf16>
    %cst_69 = arith.constant dense<0.000000e+00> : vector<32x128xf32>
    %59 = tpu.matmul %58, %57, %cst_69 {dimension_numbers = #tpu.dot_dimension_numbers<[1], [0], [0], [1], [0, 0, 1, 1], [], []>} : vector<32x128xbf16>, vector<128x128xbf16>, vector<32x128xf32> -> vector<32x128xf32>
    %60 = arith.addf %53, %59 : vector<32x128xf32>
    %c0_70 = arith.constant 0 : index
    %c0_71 = arith.constant 0 : index
    %61 = vector.load %arg5[%c0_70, %c0_71] : memref<1x128xf32, #tpu.memory_space<vmem>>, vector<1x128xf32>
    %62 = vector.broadcast %61 : vector<1x128xf32> to vector<32x128xf32>
    %63 = arith.mulf %60, %62 : vector<32x128xf32>
    %c0_72 = arith.constant 0 : index
    %c0_73 = arith.constant 0 : index
    %64 = vector.load %arg6[%c0_72, %c0_73] : memref<1x128xf32, #tpu.memory_space<vmem>>, vector<1x128xf32>
    %65 = vector.broadcast %64 : vector<1x128xf32> to vector<32x128xf32>
    %66 = arith.addf %63, %65 : vector<32x128xf32>
    %67 = vector.shape_cast %66 : vector<32x128xf32> to vector<2x16x128xf32>
    %cst_74 = arith.constant 0.000000e+00 : f32
    %68 = vector.broadcast %cst_74 : f32 to vector<2x16x128xf32>
    %69 = arith.maximumf %67, %68 : vector<2x16x128xf32>
    %c0_75 = arith.constant 0 : index
    %c1_76 = arith.constant 1 : index
    %c0_77 = arith.constant 0 : index
    %70 = vector.load %arg25[%c0_75, %c1_76, %c0_77] : memref<2x18x128xf32, #tpu.memory_space<vmem>>, vector<2x16x128xf32>
    tpu.vector_store %arg25[%c0_75, %c1_76, %c0_77], %69 {strides = array<i32>} : memref<2x18x128xf32, #tpu.memory_space<vmem>>, vector<2x16x128xf32>,
    %c0_78 = arith.constant 0 : index
    %c0_79 = arith.constant 0 : index
    %c0_80 = arith.constant 0 : index
    %71 = vector.load %arg25[%c0_78, %c0_79, %c0_80] : memref<2x18x128xf32, #tpu.memory_space<vmem>>, vector<2x16x128xf32>
    %72 = vector.shape_cast %71 : vector<2x16x128xf32> to vector<32x128xf32>
    %c0_81 = arith.constant 0 : index
    %c0_82 = arith.constant 0 : index
    %c0_83 = arith.constant 0 : index
    %73 = vector.load %arg7[%c0_81, %c0_82, %c0_83] : memref<3x128x128xbf16, #tpu.memory_space<vmem>>, vector<1x128x128xbf16>
    %74 = vector.shape_cast %73 : vector<1x128x128xbf16> to vector<128x128xbf16>
    %75 = arith.truncf %72 : vector<32x128xf32> to vector<32x128xbf16>
    %cst_84 = arith.constant dense<0.000000e+00> : vector<32x128xf32>
    %76 = tpu.matmul %75, %74, %cst_84 {dimension_numbers = #tpu.dot_dimension_numbers<[1], [0], [0], [1], [0, 0, 1, 1], [], []>} : vector<32x128xbf16>, vector<128x128xbf16>, vector<32x128xf32> -> vector<32x128xf32>
    %c0_85 = arith.constant 0 : index
    %c1_86 = arith.constant 1 : index
    %c0_87 = arith.constant 0 : index
    %77 = vector.load %arg25[%c0_85, %c1_86, %c0_87] : memref<2x18x128xf32, #tpu.memory_space<vmem>>, vector<2x16x128xf32>
    %78 = vector.shape_cast %77 : vector<2x16x128xf32> to vector<32x128xf32>
    %c1_88 = arith.constant 1 : index
    %c0_89 = arith.constant 0 : index
    %c0_90 = arith.constant 0 : index
    %79 = vector.load %arg7[%c1_88, %c0_89, %c0_90] : memref<3x128x128xbf16, #tpu.memory_space<vmem>>, vector<1x128x128xbf16>
    %80 = vector.shape_cast %79 : vector<1x128x128xbf16> to vector<128x128xbf16>
    %81 = arith.truncf %78 : vector<32x128xf32> to vector<32x128xbf16>
    %cst_91 = arith.constant dense<0.000000e+00> : vector<32x128xf32>
    %82 = tpu.matmul %81, %80, %cst_91 {dimension_numbers = #tpu.dot_dimension_numbers<[1], [0], [0], [1], [0, 0, 1, 1], [], []>} : vector<32x128xbf16>, vector<128x128xbf16>, vector<32x128xf32> -> vector<32x128xf32>
    %83 = arith.addf %76, %82 : vector<32x128xf32>
    %c0_92 = arith.constant 0 : index
    %c2_93 = arith.constant 2 : index
    %c0_94 = arith.constant 0 : index
    %84 = vector.load %arg25[%c0_92, %c2_93, %c0_94] : memref<2x18x128xf32, #tpu.memory_space<vmem>>, vector<2x16x128xf32>
    %85 = vector.shape_cast %84 : vector<2x16x128xf32> to vector<32x128xf32>
    %c2_95 = arith.constant 2 : index
    %c0_96 = arith.constant 0 : index
    %c0_97 = arith.constant 0 : index
    %86 = vector.load %arg7[%c2_95, %c0_96, %c0_97] : memref<3x128x128xbf16, #tpu.memory_space<vmem>>, vector<1x128x128xbf16>
    %87 = vector.shape_cast %86 : vector<1x128x128xbf16> to vector<128x128xbf16>
    %88 = arith.truncf %85 : vector<32x128xf32> to vector<32x128xbf16>
    %cst_98 = arith.constant dense<0.000000e+00> : vector<32x128xf32>
    %89 = tpu.matmul %88, %87, %cst_98 {dimension_numbers = #tpu.dot_dimension_numbers<[1], [0], [0], [1], [0, 0, 1, 1], [], []>} : vector<32x128xbf16>, vector<128x128xbf16>, vector<32x128xf32> -> vector<32x128xf32>
    %90 = arith.addf %83, %89 : vector<32x128xf32>
    %c0_99 = arith.constant 0 : index
    %c0_100 = arith.constant 0 : index
    %91 = vector.load %arg8[%c0_99, %c0_100] : memref<1x128xf32, #tpu.memory_space<vmem>>, vector<1x128xf32>
    %92 = vector.broadcast %91 : vector<1x128xf32> to vector<32x128xf32>
    %93 = arith.mulf %90, %92 : vector<32x128xf32>
    %c0_101 = arith.constant 0 : index
    %c0_102 = arith.constant 0 : index
    %94 = vector.load %arg9[%c0_101, %c0_102] : memref<1x128xf32, #tpu.memory_space<vmem>>, vector<1x128xf32>
    %95 = vector.broadcast %94 : vector<1x128xf32> to vector<32x128xf32>
    %96 = arith.addf %93, %95 : vector<32x128xf32>
    %97 = vector.shape_cast %96 : vector<32x128xf32> to vector<2x16x128xf32>
    %98 = arith.addf %97, %39 : vector<2x16x128xf32>
    %cst_103 = arith.constant 0.000000e+00 : f32
    %99 = vector.broadcast %cst_103 : f32 to vector<2x16x128xf32>
    %100 = arith.maximumf %98, %99 : vector<2x16x128xf32>
    %c0_104 = arith.constant 0 : index
    %c1_105 = arith.constant 1 : index
    %c0_106 = arith.constant 0 : index
    %101 = vector.load %arg25[%c0_104, %c1_105, %c0_106] : memref<2x18x128xf32, #tpu.memory_space<vmem>>, vector<2x16x128xf32>
    tpu.vector_store %arg25[%c0_104, %c1_105, %c0_106], %100 {strides = array<i32>} : memref<2x18x128xf32, #tpu.memory_space<vmem>>, vector<2x16x128xf32>,
    %c0_107 = arith.constant 0 : index
    %c0_108 = arith.constant 0 : index
    %c0_109 = arith.constant 0 : index
    %102 = tpu.strided_load %arg25[%c0_107, %c0_108, %c0_109] {strides = array<i32: 1, 2, 1>} : memref<2x18x128xf32, #tpu.memory_space<vmem>>, vector<2x8x128xf32>
    %103 = vector.shape_cast %102 : vector<2x8x128xf32> to vector<16x128xf32>
    %c0_110 = arith.constant 0 : index
    %c0_111 = arith.constant 0 : index
    %c0_112 = arith.constant 0 : index
    %104 = vector.load %arg10[%c0_110, %c0_111, %c0_112] : memref<3x128x256xbf16, #tpu.memory_space<vmem>>, vector<1x128x256xbf16>
    %105 = vector.shape_cast %104 : vector<1x128x256xbf16> to vector<128x256xbf16>
    %106 = arith.truncf %103 : vector<16x128xf32> to vector<16x128xbf16>
    %cst_113 = arith.constant dense<0.000000e+00> : vector<16x256xf32>
    %107 = tpu.matmul %106, %105, %cst_113 {dimension_numbers = #tpu.dot_dimension_numbers<[1], [0], [0], [1], [0, 0, 1, 1], [], []>} : vector<16x128xbf16>, vector<128x256xbf16>, vector<16x256xf32> -> vector<16x256xf32>
    %c0_114 = arith.constant 0 : index
    %c1_115 = arith.constant 1 : index
    %c0_116 = arith.constant 0 : index
    %108 = tpu.strided_load %arg25[%c0_114, %c1_115, %c0_116] {strides = array<i32: 1, 2, 1>} : memref<2x18x128xf32, #tpu.memory_space<vmem>>, vector<2x8x128xf32>
    %109 = vector.shape_cast %108 : vector<2x8x128xf32> to vector<16x128xf32>
    %c1_117 = arith.constant 1 : index
    %c0_118 = arith.constant 0 : index
    %c0_119 = arith.constant 0 : index
    %110 = vector.load %arg10[%c1_117, %c0_118, %c0_119] : memref<3x128x256xbf16, #tpu.memory_space<vmem>>, vector<1x128x256xbf16>
    %111 = vector.shape_cast %110 : vector<1x128x256xbf16> to vector<128x256xbf16>
    %112 = arith.truncf %109 : vector<16x128xf32> to vector<16x128xbf16>
    %cst_120 = arith.constant dense<0.000000e+00> : vector<16x256xf32>
    %113 = tpu.matmul %112, %111, %cst_120 {dimension_numbers = #tpu.dot_dimension_numbers<[1], [0], [0], [1], [0, 0, 1, 1], [], []>} : vector<16x128xbf16>, vector<128x256xbf16>, vector<16x256xf32> -> vector<16x256xf32>
    %114 = arith.addf %107, %113 : vector<16x256xf32>
    %c0_121 = arith.constant 0 : index
    %c2_122 = arith.constant 2 : index
    %c0_123 = arith.constant 0 : index
    %115 = tpu.strided_load %arg25[%c0_121, %c2_122, %c0_123] {strides = array<i32: 1, 2, 1>} : memref<2x18x128xf32, #tpu.memory_space<vmem>>, vector<2x8x128xf32>
    %116 = vector.shape_cast %115 : vector<2x8x128xf32> to vector<16x128xf32>
    %c2_124 = arith.constant 2 : index
    %c0_125 = arith.constant 0 : index
    %c0_126 = arith.constant 0 : index
    %117 = vector.load %arg10[%c2_124, %c0_125, %c0_126] : memref<3x128x256xbf16, #tpu.memory_space<vmem>>, vector<1x128x256xbf16>
    %118 = vector.shape_cast %117 : vector<1x128x256xbf16> to vector<128x256xbf16>
    %119 = arith.truncf %116 : vector<16x128xf32> to vector<16x128xbf16>
    %cst_127 = arith.constant dense<0.000000e+00> : vector<16x256xf32>
    %120 = tpu.matmul %119, %118, %cst_127 {dimension_numbers = #tpu.dot_dimension_numbers<[1], [0], [0], [1], [0, 0, 1, 1], [], []>} : vector<16x128xbf16>, vector<128x256xbf16>, vector<16x256xf32> -> vector<16x256xf32>
    %121 = arith.addf %114, %120 : vector<16x256xf32>
    %c0_128 = arith.constant 0 : index
    %c0_129 = arith.constant 0 : index
    %122 = vector.load %arg11[%c0_128, %c0_129] : memref<1x256xf32, #tpu.memory_space<vmem>>, vector<1x256xf32>
    %123 = vector.broadcast %122 : vector<1x256xf32> to vector<16x256xf32>
    %124 = arith.mulf %121, %123 : vector<16x256xf32>
    %c0_130 = arith.constant 0 : index
    %c0_131 = arith.constant 0 : index
    %125 = vector.load %arg12[%c0_130, %c0_131] : memref<1x256xf32, #tpu.memory_space<vmem>>, vector<1x256xf32>
    %126 = vector.broadcast %125 : vector<1x256xf32> to vector<16x256xf32>
    %127 = arith.addf %124, %126 : vector<16x256xf32>
    %128 = vector.shape_cast %127 : vector<16x256xf32> to vector<2x8x256xf32>
    %129 = vector.extract_strided_slice %128 {offsets = [0, 0, 128], sizes = [2, 8, 128], strides = [1, 1, 1]} : vector<2x8x256xf32> to vector<2x8x128xf32>
    %130 = vector.extract_strided_slice %128 {offsets = [0, 0, 0], sizes = [2, 8, 128], strides = [1, 1, 1]} : vector<2x8x256xf32> to vector<2x8x128xf32>
    %cst_132 = arith.constant 0.000000e+00 : f32
    %131 = vector.broadcast %cst_132 : f32 to vector<2x8x128xf32>
    %132 = arith.maximumf %130, %131 : vector<2x8x128xf32>
    %c0_133 = arith.constant 0 : index
    %c1_134 = arith.constant 1 : index
    %c0_135 = arith.constant 0 : index
    %133 = vector.load %arg26[%c0_133, %c1_134, %c0_135] : memref<2x10x128xf32, #tpu.memory_space<vmem>>, vector<2x8x128xf32>
    tpu.vector_store %arg26[%c0_133, %c1_134, %c0_135], %132 {strides = array<i32>} : memref<2x10x128xf32, #tpu.memory_space<vmem>>, vector<2x8x128xf32>,
    %c0_136 = arith.constant 0 : index
    %c0_137 = arith.constant 0 : index
    %c0_138 = arith.constant 0 : index
    %134 = vector.load %arg26[%c0_136, %c0_137, %c0_138] : memref<2x10x128xf32, #tpu.memory_space<vmem>>, vector<2x8x128xf32>
    %135 = vector.shape_cast %134 : vector<2x8x128xf32> to vector<16x128xf32>
    %c0_139 = arith.constant 0 : index
    %c0_140 = arith.constant 0 : index
    %c0_141 = arith.constant 0 : index
    %136 = vector.load %arg13[%c0_139, %c0_140, %c0_141] : memref<3x128x128xbf16, #tpu.memory_space<vmem>>, vector<1x128x128xbf16>
    %137 = vector.shape_cast %136 : vector<1x128x128xbf16> to vector<128x128xbf16>
    %138 = arith.truncf %135 : vector<16x128xf32> to vector<16x128xbf16>
    %cst_142 = arith.constant dense<0.000000e+00> : vector<16x128xf32>
    %139 = tpu.matmul %138, %137, %cst_142 {dimension_numbers = #tpu.dot_dimension_numbers<[1], [0], [0], [1], [0, 0, 1, 1], [], []>} : vector<16x128xbf16>, vector<128x128xbf16>, vector<16x128xf32> -> vector<16x128xf32>
    %c0_143 = arith.constant 0 : index
    %c1_144 = arith.constant 1 : index
    %c0_145 = arith.constant 0 : index
    %140 = vector.load %arg26[%c0_143, %c1_144, %c0_145] : memref<2x10x128xf32, #tpu.memory_space<vmem>>, vector<2x8x128xf32>
    %141 = vector.shape_cast %140 : vector<2x8x128xf32> to vector<16x128xf32>
    %c1_146 = arith.constant 1 : index
    %c0_147 = arith.constant 0 : index
    %c0_148 = arith.constant 0 : index
    %142 = vector.load %arg13[%c1_146, %c0_147, %c0_148] : memref<3x128x128xbf16, #tpu.memory_space<vmem>>, vector<1x128x128xbf16>
    %143 = vector.shape_cast %142 : vector<1x128x128xbf16> to vector<128x128xbf16>
    %144 = arith.truncf %141 : vector<16x128xf32> to vector<16x128xbf16>
    %cst_149 = arith.constant dense<0.000000e+00> : vector<16x128xf32>
    %145 = tpu.matmul %144, %143, %cst_149 {dimension_numbers = #tpu.dot_dimension_numbers<[1], [0], [0], [1], [0, 0, 1, 1], [], []>} : vector<16x128xbf16>, vector<128x128xbf16>, vector<16x128xf32> -> vector<16x128xf32>
    %146 = arith.addf %139, %145 : vector<16x128xf32>
    %c0_150 = arith.constant 0 : index
    %c2_151 = arith.constant 2 : index
    %c0_152 = arith.constant 0 : index
    %147 = vector.load %arg26[%c0_150, %c2_151, %c0_152] : memref<2x10x128xf32, #tpu.memory_space<vmem>>, vector<2x8x128xf32>
    %148 = vector.shape_cast %147 : vector<2x8x128xf32> to vector<16x128xf32>
    %c2_153 = arith.constant 2 : index
    %c0_154 = arith.constant 0 : index
    %c0_155 = arith.constant 0 : index
    %149 = vector.load %arg13[%c2_153, %c0_154, %c0_155] : memref<3x128x128xbf16, #tpu.memory_space<vmem>>, vector<1x128x128xbf16>
    %150 = vector.shape_cast %149 : vector<1x128x128xbf16> to vector<128x128xbf16>
    %151 = arith.truncf %148 : vector<16x128xf32> to vector<16x128xbf16>
    %cst_156 = arith.constant dense<0.000000e+00> : vector<16x128xf32>
    %152 = tpu.matmul %151, %150, %cst_156 {dimension_numbers = #tpu.dot_dimension_numbers<[1], [0], [0], [1], [0, 0, 1, 1], [], []>} : vector<16x128xbf16>, vector<128x128xbf16>, vector<16x128xf32> -> vector<16x128xf32>
    %153 = arith.addf %146, %152 : vector<16x128xf32>
    %c0_157 = arith.constant 0 : index
    %c0_158 = arith.constant 0 : index
    %154 = vector.load %arg14[%c0_157, %c0_158] : memref<1x128xf32, #tpu.memory_space<vmem>>, vector<1x128xf32>
    %155 = vector.broadcast %154 : vector<1x128xf32> to vector<16x128xf32>
    %156 = arith.mulf %153, %155 : vector<16x128xf32>
    %c0_159 = arith.constant 0 : index
    %c0_160 = arith.constant 0 : index
    %157 = vector.load %arg15[%c0_159, %c0_160] : memref<1x128xf32, #tpu.memory_space<vmem>>, vector<1x128xf32>
    %158 = vector.broadcast %157 : vector<1x128xf32> to vector<16x128xf32>
    %159 = arith.addf %156, %158 : vector<16x128xf32>
    %160 = vector.shape_cast %159 : vector<16x128xf32> to vector<2x8x128xf32>
    %161 = arith.addf %160, %129 : vector<2x8x128xf32>
    %cst_161 = arith.constant 0.000000e+00 : f32
    %162 = vector.broadcast %cst_161 : f32 to vector<2x8x128xf32>
    %163 = arith.maximumf %161, %162 : vector<2x8x128xf32>
    %c0_162 = arith.constant 0 : index
    %c1_163 = arith.constant 1 : index
    %c0_164 = arith.constant 0 : index
    %164 = vector.load %arg26[%c0_162, %c1_163, %c0_164] : memref<2x10x128xf32, #tpu.memory_space<vmem>>, vector<2x8x128xf32>
    tpu.vector_store %arg26[%c0_162, %c1_163, %c0_164], %163 {strides = array<i32>} : memref<2x10x128xf32, #tpu.memory_space<vmem>>, vector<2x8x128xf32>,
    %c0_165 = arith.constant 0 : index
    %c0_166 = arith.constant 0 : index
    %c0_167 = arith.constant 0 : index
    %165 = tpu.strided_load %arg26[%c0_165, %c0_166, %c0_167] {strides = array<i32: 1, 2, 1>} : memref<2x10x128xf32, #tpu.memory_space<vmem>>, vector<2x4x128xf32>
    %166 = vector.shape_cast %165 : vector<2x4x128xf32> to vector<8x128xf32>
    %c0_168 = arith.constant 0 : index
    %c0_169 = arith.constant 0 : index
    %c0_170 = arith.constant 0 : index
    %167 = vector.load %arg16[%c0_168, %c0_169, %c0_170] : memref<3x128x256xbf16, #tpu.memory_space<vmem>>, vector<1x128x256xbf16>
    %168 = vector.shape_cast %167 : vector<1x128x256xbf16> to vector<128x256xbf16>
    %169 = arith.truncf %166 : vector<8x128xf32> to vector<8x128xbf16>
    %cst_171 = arith.constant dense<0.000000e+00> : vector<8x256xf32>
    %170 = tpu.matmul %169, %168, %cst_171 {dimension_numbers = #tpu.dot_dimension_numbers<[1], [0], [0], [1], [0, 0, 1, 1], [], []>} : vector<8x128xbf16>, vector<128x256xbf16>, vector<8x256xf32> -> vector<8x256xf32>
    %c0_172 = arith.constant 0 : index
    %c1_173 = arith.constant 1 : index
    %c0_174 = arith.constant 0 : index
    %171 = tpu.strided_load %arg26[%c0_172, %c1_173, %c0_174] {strides = array<i32: 1, 2, 1>} : memref<2x10x128xf32, #tpu.memory_space<vmem>>, vector<2x4x128xf32>
    %172 = vector.shape_cast %171 : vector<2x4x128xf32> to vector<8x128xf32>
    %c1_175 = arith.constant 1 : index
    %c0_176 = arith.constant 0 : index
    %c0_177 = arith.constant 0 : index
    %173 = vector.load %arg16[%c1_175, %c0_176, %c0_177] : memref<3x128x256xbf16, #tpu.memory_space<vmem>>, vector<1x128x256xbf16>
    %174 = vector.shape_cast %173 : vector<1x128x256xbf16> to vector<128x256xbf16>
    %175 = arith.truncf %172 : vector<8x128xf32> to vector<8x128xbf16>
    %cst_178 = arith.constant dense<0.000000e+00> : vector<8x256xf32>
    %176 = tpu.matmul %175, %174, %cst_178 {dimension_numbers = #tpu.dot_dimension_numbers<[1], [0], [0], [1], [0, 0, 1, 1], [], []>} : vector<8x128xbf16>, vector<128x256xbf16>, vector<8x256xf32> -> vector<8x256xf32>
    %177 = arith.addf %170, %176 : vector<8x256xf32>
    %c0_179 = arith.constant 0 : index
    %c2_180 = arith.constant 2 : index
    %c0_181 = arith.constant 0 : index
    %178 = tpu.strided_load %arg26[%c0_179, %c2_180, %c0_181] {strides = array<i32: 1, 2, 1>} : memref<2x10x128xf32, #tpu.memory_space<vmem>>, vector<2x4x128xf32>
    %179 = vector.shape_cast %178 : vector<2x4x128xf32> to vector<8x128xf32>
    %c2_182 = arith.constant 2 : index
    %c0_183 = arith.constant 0 : index
    %c0_184 = arith.constant 0 : index
    %180 = vector.load %arg16[%c2_182, %c0_183, %c0_184] : memref<3x128x256xbf16, #tpu.memory_space<vmem>>, vector<1x128x256xbf16>
    %181 = vector.shape_cast %180 : vector<1x128x256xbf16> to vector<128x256xbf16>
    %182 = arith.truncf %179 : vector<8x128xf32> to vector<8x128xbf16>
    %cst_185 = arith.constant dense<0.000000e+00> : vector<8x256xf32>
    %183 = tpu.matmul %182, %181, %cst_185 {dimension_numbers = #tpu.dot_dimension_numbers<[1], [0], [0], [1], [0, 0, 1, 1], [], []>} : vector<8x128xbf16>, vector<128x256xbf16>, vector<8x256xf32> -> vector<8x256xf32>
    %184 = arith.addf %177, %183 : vector<8x256xf32>
    %c0_186 = arith.constant 0 : index
    %c0_187 = arith.constant 0 : index
    %185 = vector.load %arg17[%c0_186, %c0_187] : memref<1x256xf32, #tpu.memory_space<vmem>>, vector<1x256xf32>
    %186 = vector.broadcast %185 : vector<1x256xf32> to vector<8x256xf32>
    %187 = arith.mulf %184, %186 : vector<8x256xf32>
    %c0_188 = arith.constant 0 : index
    %c0_189 = arith.constant 0 : index
    %188 = vector.load %arg18[%c0_188, %c0_189] : memref<1x256xf32, #tpu.memory_space<vmem>>, vector<1x256xf32>
    %189 = vector.broadcast %188 : vector<1x256xf32> to vector<8x256xf32>
    %190 = arith.addf %187, %189 : vector<8x256xf32>
    %191 = vector.shape_cast %190 : vector<8x256xf32> to vector<2x4x256xf32>
    %192 = vector.extract_strided_slice %191 {offsets = [0, 0, 128], sizes = [2, 4, 128], strides = [1, 1, 1]} : vector<2x4x256xf32> to vector<2x4x128xf32>
    %193 = vector.extract_strided_slice %191 {offsets = [0, 0, 0], sizes = [2, 4, 128], strides = [1, 1, 1]} : vector<2x4x256xf32> to vector<2x4x128xf32>
    %cst_190 = arith.constant 0.000000e+00 : f32
    %194 = vector.broadcast %cst_190 : f32 to vector<2x4x128xf32>
    %195 = arith.maximumf %193, %194 : vector<2x4x128xf32>
    %c0_191 = arith.constant 0 : index
    %c1_192 = arith.constant 1 : index
    %c0_193 = arith.constant 0 : index
    %196 = vector.load %arg27[%c0_191, %c1_192, %c0_193] : memref<2x6x128xf32, #tpu.memory_space<vmem>>, vector<2x4x128xf32>
    tpu.vector_store %arg27[%c0_191, %c1_192, %c0_193], %195 {strides = array<i32>} : memref<2x6x128xf32, #tpu.memory_space<vmem>>, vector<2x4x128xf32>,
    %c0_194 = arith.constant 0 : index
    %c0_195 = arith.constant 0 : index
    %c0_196 = arith.constant 0 : index
    %197 = vector.load %arg27[%c0_194, %c0_195, %c0_196] : memref<2x6x128xf32, #tpu.memory_space<vmem>>, vector<2x4x128xf32>
    %198 = vector.shape_cast %197 : vector<2x4x128xf32> to vector<8x128xf32>
    %c0_197 = arith.constant 0 : index
    %c0_198 = arith.constant 0 : index
    %c0_199 = arith.constant 0 : index
    %199 = vector.load %arg19[%c0_197, %c0_198, %c0_199] : memref<3x128x128xbf16, #tpu.memory_space<vmem>>, vector<1x128x128xbf16>
    %200 = vector.shape_cast %199 : vector<1x128x128xbf16> to vector<128x128xbf16>
    %201 = arith.truncf %198 : vector<8x128xf32> to vector<8x128xbf16>
    %cst_200 = arith.constant dense<0.000000e+00> : vector<8x128xf32>
    %202 = tpu.matmul %201, %200, %cst_200 {dimension_numbers = #tpu.dot_dimension_numbers<[1], [0], [0], [1], [0, 0, 1, 1], [], []>} : vector<8x128xbf16>, vector<128x128xbf16>, vector<8x128xf32> -> vector<8x128xf32>
    %c0_201 = arith.constant 0 : index
    %c1_202 = arith.constant 1 : index
    %c0_203 = arith.constant 0 : index
    %203 = vector.load %arg27[%c0_201, %c1_202, %c0_203] : memref<2x6x128xf32, #tpu.memory_space<vmem>>, vector<2x4x128xf32>
    %204 = vector.shape_cast %203 : vector<2x4x128xf32> to vector<8x128xf32>
    %c1_204 = arith.constant 1 : index
    %c0_205 = arith.constant 0 : index
    %c0_206 = arith.constant 0 : index
    %205 = vector.load %arg19[%c1_204, %c0_205, %c0_206] : memref<3x128x128xbf16, #tpu.memory_space<vmem>>, vector<1x128x128xbf16>
    %206 = vector.shape_cast %205 : vector<1x128x128xbf16> to vector<128x128xbf16>
    %207 = arith.truncf %204 : vector<8x128xf32> to vector<8x128xbf16>
    %cst_207 = arith.constant dense<0.000000e+00> : vector<8x128xf32>
    %208 = tpu.matmul %207, %206, %cst_207 {dimension_numbers = #tpu.dot_dimension_numbers<[1], [0], [0], [1], [0, 0, 1, 1], [], []>} : vector<8x128xbf16>, vector<128x128xbf16>, vector<8x128xf32> -> vector<8x128xf32>
    %209 = arith.addf %202, %208 : vector<8x128xf32>
    %c0_208 = arith.constant 0 : index
    %c2_209 = arith.constant 2 : index
    %c0_210 = arith.constant 0 : index
    %210 = vector.load %arg27[%c0_208, %c2_209, %c0_210] : memref<2x6x128xf32, #tpu.memory_space<vmem>>, vector<2x4x128xf32>
    %211 = vector.shape_cast %210 : vector<2x4x128xf32> to vector<8x128xf32>
    %c2_211 = arith.constant 2 : index
    %c0_212 = arith.constant 0 : index
    %c0_213 = arith.constant 0 : index
    %212 = vector.load %arg19[%c2_211, %c0_212, %c0_213] : memref<3x128x128xbf16, #tpu.memory_space<vmem>>, vector<1x128x128xbf16>
    %213 = vector.shape_cast %212 : vector<1x128x128xbf16> to vector<128x128xbf16>
    %214 = arith.truncf %211 : vector<8x128xf32> to vector<8x128xbf16>
    %cst_214 = arith.constant dense<0.000000e+00> : vector<8x128xf32>
    %215 = tpu.matmul %214, %213, %cst_214 {dimension_numbers = #tpu.dot_dimension_numbers<[1], [0], [0], [1], [0, 0, 1, 1], [], []>} : vector<8x128xbf16>, vector<128x128xbf16>, vector<8x128xf32> -> vector<8x128xf32>
    %216 = arith.addf %209, %215 : vector<8x128xf32>
    %c0_215 = arith.constant 0 : index
    %c0_216 = arith.constant 0 : index
    %217 = vector.load %arg20[%c0_215, %c0_216] : memref<1x128xf32, #tpu.memory_space<vmem>>, vector<1x128xf32>
    %218 = vector.broadcast %217 : vector<1x128xf32> to vector<8x128xf32>
    %219 = arith.mulf %216, %218 : vector<8x128xf32>
    %c0_217 = arith.constant 0 : index
    %c0_218 = arith.constant 0 : index
    %220 = vector.load %arg21[%c0_217, %c0_218] : memref<1x128xf32, #tpu.memory_space<vmem>>, vector<1x128xf32>
    %221 = vector.broadcast %220 : vector<1x128xf32> to vector<8x128xf32>
    %222 = arith.addf %219, %221 : vector<8x128xf32>
    %223 = vector.shape_cast %222 : vector<8x128xf32> to vector<2x4x128xf32>
    %224 = arith.addf %223, %192 : vector<2x4x128xf32>
    %cst_219 = arith.constant 0.000000e+00 : f32
    %225 = vector.broadcast %cst_219 : f32 to vector<2x4x128xf32>
    %226 = arith.maximumf %224, %225 : vector<2x4x128xf32>
    %cst_220 = arith.constant dense<0.000000e+00> : vector<2x128xf32>
    %227 = vector.multi_reduction <add>, %226, %cst_220 [1] : vector<2x4x128xf32> to vector<2x128xf32>
    %c0_221 = arith.constant 0 : index
    %c0_222 = arith.constant 0 : index
    %228 = vector.load %arg22[%c0_221, %c0_222] : memref<128x10xf32, #tpu.memory_space<vmem>>, vector<128x10xf32>
    %cst_223 = arith.constant dense<0.000000e+00> : vector<2x10xf32>
    %229 = tpu.matmul %227, %228, %cst_223 {dimension_numbers = #tpu.dot_dimension_numbers<[1], [0], [0], [1], [0, 0, 1, 1], [], []>} : vector<2x128xf32>, vector<128x10xf32>, vector<2x10xf32> -> vector<2x10xf32>
    %c0_224 = arith.constant 0 : index
    %c0_225 = arith.constant 0 : index
    %230 = vector.load %arg23[%c0_224, %c0_225] : memref<1x10xf32, #tpu.memory_space<vmem>>, vector<1x10xf32>
    %231 = vector.broadcast %230 : vector<1x10xf32> to vector<2x10xf32>
    %232 = arith.addf %229, %231 : vector<2x10xf32>
    %c0_226 = arith.constant 0 : index
    %c0_227 = arith.constant 0 : index
    %233 = vector.load %arg24[%c0_226, %c0_227] : memref<2x10xf32, #tpu.memory_space<vmem>>, vector<2x10xf32>
    tpu.vector_store %arg24[%c0_226, %c0_227], %232 {strides = array<i32>} : memref<2x10xf32, #tpu.memory_space<vmem>>, vector<2x10xf32>,
    return
  }
}

</mosaic_0001>

<bundles_post_ra>
// kernel: efficient_resnet_forward.1
= control target key start
LH: loop header
LB: loop body
LE: loop exit
PB: predicated region body
PF: predicated region fallthrough
CT: control target
= control target key end

     0   :  { %s5434_s0 = inlined_call_operand.vmem [shape: f32[2,16,128], index: 0, kind: input, shape index: {}]   ;;  %s5435_s1 = inlined_call_operand.vmem [shape: bf16[3,128,128], index: 1, kind: input, shape index: {}]   ;;  %s5436_s2 = inlined_call_operand.vmem [shape: f32[1,128], index: 2, kind: input, shape index: {}]   ;;  %s5437_s3 = inlined_call_operand.vmem [shape: f32[1,128], index: 3, kind: input, shape index: {}]   ;;  %s5438_s4 = inlined_call_operand.vmem [shape: bf16[3,128,128], index: 4, kind: input, shape index: {}]   ;;  %s5439_s5 = inlined_call_operand.vmem [shape: f32[1,128], index: 5, kind: input, shape index: {}]   ;;  %s5440_s6 = inlined_call_operand.vmem [shape: f32[1,128], index: 6, kind: input, shape index: {}]   ;;  %s5441_s7 = inlined_call_operand.vmem [shape: bf16[3,128,128], index: 7, kind: input, shape index: {}]   ;;  %s5442_s8 = inlined_call_operand.vmem [shape: f32[1,128], index: 8, kind: input, shape index: {}]   ;;  %s5443_s9 = inlined_call_operand.vmem [shape: f32[1,128], index: 9, kind: input, shape index: {}]   ;;  %s5444_s10 = inlined_call_operand.vmem [shape: bf16[3,128,256], index: 10, kind: input, shape index: {}]   ;;  %s5445_s11 = inlined_call_operand.vmem [shape: f32[1,256], index: 11, kind: input, shape index: {}]   ;;  %s5446_s12 = inlined_call_operand.vmem [shape: f32[1,256], index: 12, kind: input, shape index: {}]   ;;  %s5447_s13 = inlined_call_operand.vmem [shape: bf16[3,128,128], index: 13, kind: input, shape index: {}]   ;;  %s5448_s14 = inlined_call_operand.vmem [shape: f32[1,128], index: 14, kind: input, shape index: {}]   ;;  %s5449_s15 = inlined_call_operand.vmem [shape: f32[1,128], index: 15, kind: input, shape index: {}]   ;;  %s5450_s16 = inlined_call_operand.vmem [shape: bf16[3,128,256], index: 16, kind: input, shape index: {}]   ;;  %s5451_s17 = inlined_call_operand.vmem [shape: f32[1,256], index: 17, kind: input, shape index: {}]   ;;  %s5452_s18 = inlined_call_operand.vmem [shape: f32[1,256], index: 18, kind: input, shape index: {}]   ;;  %s5453_s19 = inlined_call_operand.vmem [shape: bf16[3,128,128], index: 19, kind: input, shape index: {}]   ;;  %s5454_s20 = inlined_call_operand.vmem [shape: f32[1,128], index: 20, kind: input, shape index: {}]   ;;  %s5455_s21 = inlined_call_operand.vmem [shape: f32[1,128], index: 21, kind: input, shape index: {}]   ;;  %s5456_s22 = inlined_call_operand.vmem [shape: f32[128,10], index: 22, kind: input, shape index: {}]   ;;  %s5457_s23 = inlined_call_operand.vmem [shape: f32[1,10], index: 23, kind: input, shape index: {}]   ;;  %s5458_s24 = inlined_call_operand.hbm [shape: f32[2,10], index: 24, kind: output, shape index: {}]  }
   0x1   :  { %5463 = sst [smem:[#allocation8_spill]] %s5434_s0 }
   0x2   :  { %5464 = sst [smem:[#allocation9_spill]] %s5435_s1 }
   0x3   :  { %5465 = sst [smem:[#allocation10_spill]] %s5436_s2 }
   0x4   :  { %5466 = sst [smem:[#allocation11_spill]] %s5437_s3 }
   0x5   :  { %5467 = sst [smem:[#allocation12_spill]] %s5438_s4 }
   0x6   :  { %5468 = sst [smem:[#allocation13_spill]] %s5439_s5 }
   0x7   :  { %5469 = sst [smem:[#allocation14_spill]] %s5440_s6 }
   0x8   :  { %5470 = sst [smem:[#allocation15_spill]] %s5441_s7 }
   0x9   :  { %5471 = sst [smem:[#allocation16_spill]] %s5442_s8 }
   0xa   :  { %s5472_s27 = sld [smem:[#allocation9_spill]]  ;;  %v4401_v2 = vmov 0.0   ;;  %s5473_s4 = sld [smem:[#allocation8_spill]] }
   0xb   :  { %79 = vst [vmem:[#allocation2] sm:$0x1] %v4401_v2  ;;  %80 = vst [vmem:[#allocation2 + $0x18] sm:$0x1] %v4401_v2  ;;  %s5474_s7 = sld [smem:[#allocation12_spill]] }
   0xc   :  { %81 = vst [vmem:[#allocation2 + $0x11] sm:$0x1] %v4401_v2  ;;  %82 = vst [vmem:[#allocation2 + $0x29] sm:$0x1] %v4401_v2 }
   0xd   :  { %83 = vst [vmem:[#allocation3] sm:$0x1] %v4401_v2  ;;  %84 = vst [vmem:[#allocation3 + $0x10] sm:$0x1] %v4401_v2 }
   0xe   :  { %85 = vst [vmem:[#allocation3 + $0x9] sm:$0x1] %v4401_v2  ;;  %86 = vst [vmem:[#allocation3 + $0x19] sm:$0x1] %v4401_v2 }
   0xf   :  { %87 = vst [vmem:[#allocation4] sm:$0x1] %v4401_v2  ;;  %88 = vst [vmem:[#allocation4 + $0x8] sm:$0x1] %v4401_v2 }
  0x10   :  { %v4110_v0 = vld [vmem:[%s5472_s27] sm:$0xff]   ;;  %v4111_v1 = vld [vmem:[%s5472_s27 + $0x8] sm:$0xff]   ;;  %89 = vst [vmem:[#allocation4 + $0x5] sm:$0x1] %v4401_v2  ;;  %90 = vst [vmem:[#allocation4 + $0xd] sm:$0x1] %v4401_v2 }
  0x11   :  { %3710 = vmatprep.subr.bf16.mxu0 %v4110_v0  ;;  %v4112_v3 = vld [vmem:[%s5472_s27 + $0x10] sm:$0xff]   ;;  %v4113_v4 = vld [vmem:[%s5472_s27 + $0x18] sm:$0xff]   ;;  %v4118_v5 = vld [vmem:[%s5472_s27 + $0x40] sm:$0xff]  }
  0x12   :  { %3711 = vmatpush3.bf16.msra.mxu0 %v4110_v0  ;;  %v91_v6 = vld [vmem:[%s5473_s4] sm:$0xff]  ;;  %v92_v7 = vld [vmem:[%s5473_s4 + $0x8] sm:$0xff]  ;;  %3690 = vmatprep.subr.bf16.mxu1 %v4118_v5  ;;  %v4573_v11 = vld [vmem:[%s5473_s4 + $0x10] sm:$0xff] }
  0x13   :  { %3712 = vmatprep.subr.bf16.mxu0 %v4111_v1  ;;  %v4114_v8 = vld [vmem:[%s5472_s27 + $0x20] sm:$0xff]   ;;  %95 = vst [vmem:[#allocation2 + $0x1] sm:$0xff] %v91_v6  ;;  %96 = vst [vmem:[#allocation2 + $0x9] sm:$0xff] %v92_v7  ;;  %v142_v9 = vpack.c.bf16 %v92_v7, %v91_v6  ;;  %3691 = vmatpush3.bf16.msra.mxu1 %v4118_v5  ;;  %v4120_v10 = vld [vmem:[%s5472_s27 + $0x48] sm:$0xff]  }
  0x14   :  { %v94_v12 = vld [vmem:[%s5473_s4 + $0x18] sm:$0xff]  ;;  %97 = vst [vmem:[#allocation2 + $0x19] sm:$0xff] %v4573_v11  ;;  %3692 = vmatprep.subr.bf16.mxu1 %v4120_v10  ;;  %v4122_v13 = vld [vmem:[%s5472_s27 + $0x50] sm:$0xff]   ;;  %v4115_v14 = vld [vmem:[%s5472_s27 + $0x28] sm:$0xff]  }
  0x15   :  { %3706 = vmatprep.mubr.bf16.mxu1 %v142_v9  ;;  %98 = vst [vmem:[#allocation2 + $0x21] sm:$0xff] %v94_v12  ;;  %v4124_v17 = vld [vmem:[%s5472_s27 + $0x58] sm:$0xff]   ;;  %v4116_v19 = vld [vmem:[%s5472_s27 + $0x30] sm:$0xff]   ;;  %v4126_v20 = vld [vmem:[%s5472_s27 + $0x60] sm:$0xff]   ;;  %v143_v36 = vpack.c.bf16 %v94_v12, %v4573_v11 }
  0x16   :  { %3713 = vmatpush3.bf16.msra.mxu0 %v4111_v1  ;;  %v4117_v21 = vld [vmem:[%s5472_s27 + $0x38] sm:$0xff]   ;;  %v4128_v22 = vld [vmem:[%s5472_s27 + $0x68] sm:$0xff]   ;;  %v4119_v23 = vld [vmem:[%s5472_s27 + $0x80] sm:$0xff]  }
  0x17   :  { %3714 = vmatprep.subr.bf16.mxu0 %v4112_v3  ;;  %3693 = vmatpush3.bf16.msra.mxu1 %v4120_v10  ;;  %v4130_v26 = vld [vmem:[%s5472_s27 + $0x70] sm:$0xff]   ;;  %v4121_v30 = vld [vmem:[%s5472_s27 + $0x88] sm:$0xff]   ;;  %v4132_v31 = vld [vmem:[%s5472_s27 + $0x78] sm:$0xff]  }
  0x18   :  { %3694 = vmatprep.subr.bf16.mxu1 %v4122_v13  ;;  %v4123_v33 = vld [vmem:[%s5472_s27 + $0x90] sm:$0xff]   ;;  %v4134_v34 = vld [vmem:[%s5474_s7 + $0x40] sm:$0xff]   ;;  %v4125_v35 = vld [vmem:[%s5472_s27 + $0x98] sm:$0xff]  }
  0x19   :  { %v4135_v37 = vld [vmem:[%s5474_s7 + $0x48] sm:$0xff]   ;;  %v4127_v38 = vld [vmem:[%s5472_s27 + $0xa0] sm:$0xff]   ;;  %v4131_v40 = vld [vmem:[%s5472_s27 + $0xb0] sm:$0xff]  }
  0x1a   :  { %3715 = vmatpush3.bf16.msra.mxu0 %v4112_v3  ;;  %v99_v15 = vld [vmem:[#allocation2] sm:$0xff]  ;;  %v100_v16 = vld [vmem:[#allocation2 + $0x8] sm:$0xff]  ;;  %v4133_v41 = vld [vmem:[%s5472_s27 + $0xb8] sm:$0xff]  }
  0x1b   :  { %3716 = vmatprep.subr.bf16.mxu0 %v4113_v4  ;;  %v119_v18 = vpack.c.bf16 %v100_v16, %v99_v15  ;;  %3695 = vmatpush3.bf16.msra.mxu1 %v4122_v13  ;;  %v101_v24 = vld [vmem:[#allocation2 + $0x18] sm:$0xff]  ;;  %v338_v27 = vld [vmem:[#allocation2 + $0x2] sm:$0xff]  ;;  %v339_v28 = vld [vmem:[#allocation2 + $0xa] sm:$0xff] }
  0x1c   :  { %3696 = vmatprep.subr.bf16.mxu1 %v4124_v17  ;;  %v102_v25 = vld [vmem:[#allocation2 + $0x20] sm:$0xff]  ;;  %v359_v32 = vpack.c.bf16 %v339_v28, %v338_v27  ;;  %v4129_v39 = vld [vmem:[%s5472_s27 + $0xa8] sm:$0xff]  }
  0x1d   :  { %3726 = vmatprep.mubr.bf16.mxu0 %v119_v18  ;;  %v120_v29 = vpack.c.bf16 %v102_v25, %v101_v24  ;;  %v340_v42 = vld [vmem:[#allocation2 + $0x1a] sm:$0xff]  ;;  %v341_v43 = vld [vmem:[#allocation2 + $0x22] sm:$0xff] }
  0x1e   :  { %3717 = vmatpush3.bf16.msra.mxu0 %v4113_v4  ;;  %v360_v44 = vpack.c.bf16 %v341_v43, %v340_v42 }
  0x1f   :  { %3718 = vmatprep.subr.bf16.mxu0 %v4114_v8  ;;  %3697 = vmatpush3.bf16.msra.mxu1 %v4124_v17 }
  0x20   :  { %3698 = vmatprep.subr.bf16.mxu1 %v4126_v20 }
  0x22   :  { %3719 = vmatpush3.bf16.msra.mxu0 %v4114_v8 }
  0x23   :  { %3720 = vmatprep.subr.bf16.mxu0 %v4115_v14  ;;  %3699 = vmatpush3.bf16.msra.mxu1 %v4126_v20 }
  0x24   :  { %3700 = vmatprep.subr.bf16.mxu1 %v4128_v22 }
  0x26   :  { %3721 = vmatpush3.bf16.msra.mxu0 %v4115_v14 }
  0x27   :  { %3722 = vmatprep.subr.bf16.mxu0 %v4116_v19  ;;  %3701 = vmatpush3.bf16.msra.mxu1 %v4128_v22 }
  0x28   :  { %3702 = vmatprep.subr.bf16.mxu1 %v4130_v26 }
  0x2a   :  { %3723 = vmatpush3.bf16.msra.mxu0 %v4116_v19 }
  0x2b   :  { %3724 = vmatprep.subr.bf16.mxu0 %v4117_v21  ;;  %3703 = vmatpush3.bf16.msra.mxu1 %v4130_v26 }
  0x2c   :  { %3704 = vmatprep.subr.bf16.mxu1 %v4132_v31 }
  0x2e   :  { %3725 = vmatpush3.bf16.msra.mxu0 %v4117_v21 }
  0x2f   :  { %3730 = vmatprep.subr.bf16.mxu0 %v4119_v23  ;;  %3705 = vmatpush3.bf16.msra.mxu1 %v4132_v31 }
  0x30   :  { %3750 = vmatprep.subr.bf16.mxu1 %v4134_v34 }
  0x31   :  { %3727 = vmatmul.mubr.bf16.vlgmr.msra.gmra.mrb[0].mxu0 %v120_v29 }
  0x32   :  { %3731 = vmatpush3.bf16.msra.mxu0 %v4119_v23  ;;  %3746 = vmatprep.mubr.bf16.mxu0 %v359_v32 }
  0x33   :  { %3732 = vmatprep.subr.bf16.mxu0 %v4121_v30  ;;  %3707 = vmatmul.mubr.bf16.vlgmr.msra.gmra.mrb[0].mxu1 %v143_v36 }
  0x34   :  { %3751 = vmatpush3.bf16.msra.mxu1 %v4134_v34 }
  0x35   :  { %3752 = vmatprep.subr.bf16.mxu1 %v4135_v37 }
  0x36   :  { %3733 = vmatpush3.bf16.msra.mxu0 %v4121_v30 }
  0x37   :  { %3734 = vmatprep.subr.bf16.mxu0 %v4123_v33 }
  0x38   :  { %3753 = vmatpush3.bf16.msra.mxu1 %v4135_v37 }
  0x3a   :  { %3735 = vmatpush3.bf16.msra.mxu0 %v4123_v33 }
  0x3b   :  { %3736 = vmatprep.subr.bf16.mxu0 %v4125_v35 }
  0x3e   :  { %3737 = vmatpush3.bf16.msra.mxu0 %v4125_v35 }
  0x3f   :  { %3738 = vmatprep.subr.bf16.mxu0 %v4127_v38 }
  0x42   :  { %3739 = vmatpush3.bf16.msra.mxu0 %v4127_v38 }
  0x43   :  { %3740 = vmatprep.subr.bf16.mxu0 %v4129_v39 }
  0x46   :  { %3741 = vmatpush3.bf16.msra.mxu0 %v4129_v39 }
  0x47   :  { %3742 = vmatprep.subr.bf16.mxu0 %v4131_v40 }
  0x4a   :  { %3743 = vmatpush3.bf16.msra.mxu0 %v4131_v40 }
  0x4b   :  { %3744 = vmatprep.subr.bf16.mxu0 %v4133_v41 }
  0x4e   :  { %3745 = vmatpush3.bf16.msra.mxu0 %v4133_v41 }
  0x51   :  { %3747 = vmatmul.mubr.bf16.vlgmr.msra.gmra.mrb[0].mxu0 %v360_v44 }
  0x52   :  { %29 = vsyncpa [#allocation6], 0  ;;  %v4136_v45 = vld [vmem:[%s5474_s7 + $0x50] sm:$0xff]   ;;  %v4137_v46 = vld [vmem:[%s5474_s7 + $0x58] sm:$0xff]   ;;  %s5475_s3 = sld [smem:[#allocation15_spill]]  ;;  %s5476_s26 = sld [smem:[#allocation10_spill]] }
  0x53   :  { %3754 = vmatprep.subr.bf16.mxu1 %v4136_v45  ;;  %v4138_v47 = vld [vmem:[%s5474_s7 + $0x60] sm:$0xff]   ;;  %v4139_v48 = vld [vmem:[%s5474_s7 + $0x68] sm:$0xff]   ;;  %v4140_v49 = vld [vmem:[%s5474_s7 + $0x70] sm:$0xff]   ;;  %s5477_s2 = sld [smem:[#allocation11_spill]]  ;;  %s5478_s30 = sld [smem:[#allocation13_spill]]  ;;  %vm4403_vm0 = vmmov 0  }
  0x54   :  { %3755 = vmatpush3.bf16.msra.mxu1 %v4136_v45  ;;  %v4141_v50 = vld [vmem:[%s5474_s7 + $0x78] sm:$0xff]   ;;  %v4142_v51 = vld [vmem:[%s5474_s7] sm:$0xff]   ;;  %v4143_v20 = vld [vmem:[%s5474_s7 + $0x8] sm:$0xff]   ;;  %s5479_s8 = sld [smem:[#allocation14_spill]]  ;;  %vm2949_vm1 = vcmask 1043456   ;;  %vm2989_vm2 = vcmask 1041409  }
  0x55   :  { %3756 = vmatprep.subr.bf16.mxu1 %v4137_v46  ;;  %v4144_v21 = vld [vmem:[%s5474_s7 + $0x10] sm:$0xff]   ;;  %v4145_v25 = vld [vmem:[%s5474_s7 + $0x18] sm:$0xff]   ;;  %v4146_v26 = vld [vmem:[%s5474_s7 + $0x20] sm:$0xff]   ;;  %vm3062_vm3 = vcmask 74752  }
  0x56   :  { %v4147_v27 = vld [vmem:[%s5474_s7 + $0x28] sm:$0xff]   ;;  %v4148_v28 = vld [vmem:[%s5474_s7 + $0x30] sm:$0xff]   ;;  %v4149_v29 = vld [vmem:[%s5474_s7 + $0x38] sm:$0xff]  }
  0x57   :  { %v4150_v30 = vld [vmem:[%s5474_s7 + $0x80] sm:$0xff]   ;;  %v4151_v36 = vld [vmem:[%s5474_s7 + $0x88] sm:$0xff]   ;;  %v4152_v38 = vld [vmem:[%s5474_s7 + $0x90] sm:$0xff]  }
  0x58   :  { %3757 = vmatpush3.bf16.msra.mxu1 %v4137_v46  ;;  %v4158_v52 = vld [vmem:[%s5475_s3 + $0x40] sm:$0xff]   ;;  %v4159_v53 = vld [vmem:[%s5475_s3 + $0x48] sm:$0xff]   ;;  %v4160_v54 = vld [vmem:[%s5475_s3 + $0x50] sm:$0xff]  }
  0x59   :  { %3758 = vmatprep.subr.bf16.mxu1 %v4138_v47  ;;  %3810 = vmatprep.subr.bf16.mxu0 %v4158_v52  ;;  %v3134_v60 = vld [vmem:[%s5476_s26] ss:$0 sm:$0xff]  ;;  %v4153_v39 = vld [vmem:[%s5474_s7 + $0x98] sm:$0xff]   ;;  %v4155_v41 = vld [vmem:[%s5474_s7 + $0xa8] sm:$0xff]   ;;  %s5480_s26 = sld [smem:[#allocation16_spill]] }
  0x5a   :  { %3811 = vmatpush3.bf16.msra.mxu0 %v4158_v52  ;;  %v3135_v63 = vld [vmem:[%s5477_s2] ss:$0 sm:$0xff]  ;;  %v4156_v42 = vld [vmem:[%s5474_s7 + $0xb0] sm:$0xff]   ;;  %v4157_v43 = vld [vmem:[%s5474_s7 + $0xb8] sm:$0xff]  }
  0x5b   :  { %3812 = vmatprep.subr.bf16.mxu0 %v4159_v53  ;;  %v4154_v40 = vld [vmem:[%s5474_s7 + $0xa0] sm:$0xff]  }
  0x5c   :  { %3759 = vmatpush3.bf16.msra.mxu1 %v4138_v47  ;;  %v4161_v47 = vld [vmem:[%s5475_s3 + $0x58] sm:$0xff]   ;;  %v4166_v52 = vld [vmem:[%s5475_s3] sm:$0xff]  }
  0x5d   :  { %3760 = vmatprep.subr.bf16.mxu1 %v4139_v48 }
  0x5e   :  { %3813 = vmatpush3.bf16.msra.mxu0 %v4159_v53  ;;  %v4182_v53 = vld [vmem:[%s5444_s10 + $0x80] ss:$8 sps:$4 sm:$0xff]  }
  0x5f   :  { %3814 = vmatprep.subr.bf16.mxu0 %v4160_v54 }
  0x60   :  { %3761 = vmatpush3.bf16.msra.mxu1 %v4139_v48  ;;  %v4162_v48 = vld [vmem:[%s5475_s3 + $0x60] sm:$0xff]  }
  0x61   :  { %3762 = vmatprep.subr.bf16.mxu1 %v4140_v49 }
  0x62   :  { %3815 = vmatpush3.bf16.msra.mxu0 %v4160_v54  ;;  %v4184_v54 = vld [vmem:[%s5444_s10 + $0x84] ss:$8 sps:$4 sm:$0xff]  }
  0x63   :  { %3816 = vmatprep.subr.bf16.mxu0 %v4161_v47 }
  0x64   :  { %3763 = vmatpush3.bf16.msra.mxu1 %v4140_v49  ;;  %v4163_v49 = vld [vmem:[%s5475_s3 + $0x68] sm:$0xff]  }
  0x65   :  { %3764 = vmatprep.subr.bf16.mxu1 %v4141_v50 }
  0x66   :  { %3817 = vmatpush3.bf16.msra.mxu0 %v4161_v47  ;;  %v4193_v47 = vld [vmem:[%s5444_s10 + $0xb4] ss:$8 sps:$4 sm:$0xff]  }
  0x67   :  { %3818 = vmatprep.subr.bf16.mxu0 %v4162_v48 }
  0x68   :  { %3765 = vmatpush3.bf16.msra.mxu1 %v4141_v50  ;;  %v4164_v50 = vld [vmem:[%s5475_s3 + $0x70] sm:$0xff]  }
  0x69   :  { %3770 = vmatprep.subr.bf16.mxu1 %v4142_v51 }
  0x6a   :  { %3819 = vmatpush3.bf16.msra.mxu0 %v4162_v48  ;;  %v4191_v48 = vld [vmem:[%s5444_s10 + $0xb0] ss:$8 sps:$4 sm:$0xff]  }
  0x6b   :  { %3820 = vmatprep.subr.bf16.mxu0 %v4163_v49 }
  0x6e   :  { %3821 = vmatpush3.bf16.msra.mxu0 %v4163_v49  ;;  %v4196_v49 = vld [vmem:[%s5444_s10 + $0xc4] ss:$8 sps:$4 sm:$0xff]  }
  0x6f   :  { %3822 = vmatprep.subr.bf16.mxu0 %v4164_v50 }
  0x72   :  { %3823 = vmatpush3.bf16.msra.mxu0 %v4164_v50  ;;  %v4194_v50 = vld [vmem:[%s5444_s10 + $0xc0] ss:$8 sps:$4 sm:$0xff]  }
 0x106   :  { %v3708_v55 = vpop.f32.mrb[0].mxu1 }
 0x107   :  { %v226_v56 = vpop.f32.mrb[1].mxu1 }
 0x108   :  { %v3709_v57 = vpop.f32.mrb[2].mxu1 }
 0x109   :  { %v229_v58 = vpop.f32.mrb[3].mxu1 }
 0x124   :  { %v3748_v59 = vpop.f32.mrb[0].mxu0 }
 0x125   :  { %v4049_v61 = vadd.f32 %v3748_v59, %v3708_v55  ;;  %v443_v62 = vpop.f32.mrb[1].mxu0  ;;  %v4187_v55 = vld [vmem:[%s5444_s10 + $0x94] ss:$8 sps:$4 sm:$0xff]   ;;  %v3192_v59 = vld [vmem:[%s5478_s30] ss:$0 sm:$0xff] }
 0x126   :  { %v4050_v0 = vadd.f32 %v443_v62, %v226_v56  ;;  %v3749_v1 = vpop.f32.mrb[2].mxu0  ;;  %v4185_v56 = vld [vmem:[%s5444_s10 + $0x90] ss:$8 sps:$4 sm:$0xff]  }
 0x127   :  { %v471_v3 = vmul.f32 %v4049_v61, %v3134_v60  ;;  %v4051_v4 = vadd.f32 %v3749_v1, %v3709_v57  ;;  %v446_v5 = vpop.f32.mrb[3].mxu0  ;;  %v4190_v57 = vld [vmem:[%s5444_s10 + $0xa4] ss:$8 sps:$4 sm:$0xff]   ;;  %v3193_v61 = vld [vmem:[%s5479_s8] ss:$0 sm:$0xff] }
 0x128   :  { %v469_v6 = vmul.f32 %v4050_v0, %v3134_v60  ;;  %v4052_v7 = vadd.f32 %v446_v5, %v229_v58  ;;  %v4188_v58 = vld [vmem:[%s5444_s10 + $0xa0] ss:$8 sps:$4 sm:$0xff]  }
 0x129   :  { %v482_v8 = vadd.f32 %v3135_v63, %v471_v3  ;;  %v472_v9 = vmul.f32 %v4051_v4, %v3134_v60 }
 0x12a   :  { %v480_v10 = vadd.f32 %v3135_v63, %v469_v6  ;;  %v470_v11 = vmul.f32 %v4052_v7, %v3134_v60 }
 0x12b   :  { %v4673_v12 = vmax.f32 %v482_v8, 0.0  ;;  %v483_v13 = vadd.f32 %v3135_v63, %v472_v9 }
 0x12c   :  { %v4675_v14 = vmax.f32 %v480_v10, 0.0  ;;  %v481_v15 = vadd.f32 %v3135_v63, %v470_v11 }
 0x12d   :  { %490 = vst [vmem:[#allocation2 + $0x19] sm:$0xff] %v4673_v12  ;;  %v4678_v16 = vmax.f32 %v483_v13, 0.0 }
 0x12e   :  { %488 = vst [vmem:[#allocation2 + $0x1] sm:$0xff] %v4675_v14  ;;  %v4681_v17 = vmax.f32 %v481_v15, 0.0 }
 0x12f   :  { %491 = vst [vmem:[#allocation2 + $0x21] sm:$0xff] %v4678_v16  ;;  %v536_v19 = vpack.c.bf16 %v4678_v16, %v4673_v12 }
 0x130   :  { %489 = vst [vmem:[#allocation2 + $0x9] sm:$0xff] %v4681_v17  ;;  %v535_v18 = vpack.c.bf16 %v4681_v17, %v4675_v14 }
 0x132   :  { %3766 = vmatprep.mubr.bf16.mxu1 %v535_v18 }
 0x133   :  { %3767 = vmatmul.mubr.bf16.vlgmr.msra.gmra.mrb[4].mxu1 %v536_v19 }
 0x134   :  { %3771 = vmatpush3.bf16.msra.mxu1 %v4142_v51  ;;  %v494_v34 = vld [vmem:[#allocation2 + $0x18] sm:$0xff] }
 0x135   :  { %3772 = vmatprep.subr.bf16.mxu1 %v4143_v20  ;;  %v492_v22 = vld [vmem:[#allocation2] sm:$0xff]  ;;  %v4165_v51 = vld [vmem:[%s5475_s3 + $0x78] sm:$0xff]  }
 0x136   :  { %v495_v31 = vld [vmem:[#allocation2 + $0x20] sm:$0xff]  ;;  %3824 = vmatprep.subr.bf16.mxu0 %v4165_v51 }
 0x137   :  { %v493_v23 = vld [vmem:[#allocation2 + $0x8] sm:$0xff]  ;;  %v513_v35 = vpack.c.bf16 %v495_v31, %v494_v34  ;;  %v733_v44 = vld [vmem:[#allocation2 + $0x1a] sm:$0xff]  ;;  %3825 = vmatpush3.bf16.msra.mxu0 %v4165_v51 }
 0x138   :  { %v512_v24 = vpack.c.bf16 %v493_v23, %v492_v22  ;;  %3773 = vmatpush3.bf16.msra.mxu1 %v4143_v20  ;;  %v731_v32 = vld [vmem:[#allocation2 + $0x2] sm:$0xff]  ;;  %v732_v33 = vld [vmem:[#allocation2 + $0xa] sm:$0xff]  ;;  %3830 = vmatprep.subr.bf16.mxu0 %v4166_v52  ;;  %v4199_v51 = vld [vmem:[%s5444_s10 + $0xd4] ss:$8 sps:$4 sm:$0xff]  }
 0x139   :  { %3774 = vmatprep.subr.bf16.mxu1 %v4144_v21  ;;  %v752_v37 = vpack.c.bf16 %v732_v33, %v731_v32  ;;  %v734_v45 = vld [vmem:[#allocation2 + $0x22] sm:$0xff] }
 0x13a   :  { %3786 = vmatprep.mubr.bf16.mxu1 %v512_v24  ;;  %v753_v46 = vpack.c.bf16 %v734_v45, %v733_v44  ;;  %v4167_v20 = vld [vmem:[%s5475_s3 + $0x8] sm:$0xff]  }
 0x13c   :  { %3775 = vmatpush3.bf16.msra.mxu1 %v4144_v21  ;;  %v4168_v21 = vld [vmem:[%s5475_s3 + $0x10] sm:$0xff]  }
 0x13d   :  { %3776 = vmatprep.subr.bf16.mxu1 %v4145_v25 }
 0x140   :  { %3777 = vmatpush3.bf16.msra.mxu1 %v4145_v25  ;;  %v4169_v25 = vld [vmem:[%s5475_s3 + $0x18] sm:$0xff]  }
 0x141   :  { %3778 = vmatprep.subr.bf16.mxu1 %v4146_v26 }
 0x144   :  { %3779 = vmatpush3.bf16.msra.mxu1 %v4146_v26  ;;  %v4170_v26 = vld [vmem:[%s5475_s3 + $0x20] sm:$0xff]  }
 0x145   :  { %3780 = vmatprep.subr.bf16.mxu1 %v4147_v27 }
 0x148   :  { %3781 = vmatpush3.bf16.msra.mxu1 %v4147_v27  ;;  %v4171_v27 = vld [vmem:[%s5475_s3 + $0x28] sm:$0xff]  }
 0x149   :  { %3782 = vmatprep.subr.bf16.mxu1 %v4148_v28 }
 0x14c   :  { %3783 = vmatpush3.bf16.msra.mxu1 %v4148_v28  ;;  %v4172_v28 = vld [vmem:[%s5475_s3 + $0x30] sm:$0xff]  }
 0x14d   :  { %3784 = vmatprep.subr.bf16.mxu1 %v4149_v29 }
 0x150   :  { %3785 = vmatpush3.bf16.msra.mxu1 %v4149_v29  ;;  %v4173_v29 = vld [vmem:[%s5475_s3 + $0x38] sm:$0xff]  }
 0x151   :  { %3790 = vmatprep.subr.bf16.mxu1 %v4150_v30 }
 0x153   :  { %3787 = vmatmul.mubr.bf16.vlgmr.msra.gmra.mrb[4].mxu1 %v513_v35 }
 0x154   :  { %3791 = vmatpush3.bf16.msra.mxu1 %v4150_v30  ;;  %3806 = vmatprep.mubr.bf16.mxu1 %v752_v37  ;;  %v4174_v30 = vld [vmem:[%s5475_s3 + $0x80] sm:$0xff]  }
 0x155   :  { %3792 = vmatprep.subr.bf16.mxu1 %v4151_v36 }
 0x158   :  { %3793 = vmatpush3.bf16.msra.mxu1 %v4151_v36  ;;  %v4175_v36 = vld [vmem:[%s5475_s3 + $0x88] sm:$0xff]  }
 0x159   :  { %3794 = vmatprep.subr.bf16.mxu1 %v4152_v38 }
 0x15c   :  { %3795 = vmatpush3.bf16.msra.mxu1 %v4152_v38  ;;  %v4176_v38 = vld [vmem:[%s5475_s3 + $0x90] sm:$0xff]  }
 0x15d   :  { %3796 = vmatprep.subr.bf16.mxu1 %v4153_v39 }
 0x160   :  { %3797 = vmatpush3.bf16.msra.mxu1 %v4153_v39  ;;  %v4177_v39 = vld [vmem:[%s5475_s3 + $0x98] sm:$0xff]  }
 0x161   :  { %3798 = vmatprep.subr.bf16.mxu1 %v4154_v40 }
 0x164   :  { %3799 = vmatpush3.bf16.msra.mxu1 %v4154_v40  ;;  %v4178_v40 = vld [vmem:[%s5475_s3 + $0xa0] sm:$0xff]  }
 0x165   :  { %3800 = vmatprep.subr.bf16.mxu1 %v4155_v41 }
 0x168   :  { %3801 = vmatpush3.bf16.msra.mxu1 %v4155_v41  ;;  %v4179_v41 = vld [vmem:[%s5475_s3 + $0xa8] sm:$0xff]  }
 0x169   :  { %3802 = vmatprep.subr.bf16.mxu1 %v4156_v42 }
 0x16c   :  { %3803 = vmatpush3.bf16.msra.mxu1 %v4156_v42  ;;  %v4180_v42 = vld [vmem:[%s5475_s3 + $0xb0] sm:$0xff]  }
 0x16d   :  { %3804 = vmatprep.subr.bf16.mxu1 %v4157_v43 }
 0x170   :  { %3805 = vmatpush3.bf16.msra.mxu1 %v4157_v43  ;;  %v4181_v43 = vld [vmem:[%s5475_s3 + $0xb8] sm:$0xff]  }
 0x171   :  { %1404 = vmatprep.subr.bf16.mxu1 %v4184_v54  ;;  %v4200_v54 = vld [vmem:[%s5444_s10 + $0xe0] ss:$8 sps:$4 sm:$0xff]  }
 0x173   :  { %3807 = vmatmul.mubr.bf16.vlgmr.msra.gmra.mrb[4].mxu1 %v753_v46 }
 0x174   :  { %1405 = vmatpush1.bf16.msra.mxu1 %v4182_v53  ;;  %v4202_v53 = vld [vmem:[%s5444_s10 + $0xe4] ss:$8 sps:$4 sm:$0xff]  }
 0x175   :  { %1406 = vmatprep.subr.bf16.mxu1 %v4187_v55  ;;  %v4205_v55 = vld [vmem:[%s5444_s10 + $0xf4] ss:$8 sps:$4 sm:$0xff]  }
 0x178   :  { %1407 = vmatpush1.bf16.msra.mxu1 %v4185_v56  ;;  %v4203_v56 = vld [vmem:[%s5444_s10 + $0xf0] ss:$8 sps:$4 sm:$0xff]  }
 0x179   :  { %1408 = vmatprep.subr.bf16.mxu1 %v4190_v57  ;;  %v4402_v57 = vmov 0  }
 0x17a   :  { %1436 = vmatprep.mubr.bf16.mxu1 %v4402_v57 }
 0x17c   :  { %1409 = vmatpush1.bf16.msra.mxu1 %v4188_v58  ;;  %v4208_v58 = vld [vmem:[%s5444_s10 + $0x4] ss:$8 sps:$4 sm:$0xff]  }
 0x17d   :  { %1410 = vmatprep.subr.bf16.mxu1 %v4193_v47  ;;  %v4238_v47 = vld [vmem:[%s5444_s10 + $0x124] ss:$8 sps:$4 sm:$0xff]  }
 0x180   :  { %1411 = vmatpush1.bf16.msra.mxu1 %v4191_v48  ;;  %v4236_v48 = vld [vmem:[%s5444_s10 + $0x120] ss:$8 sps:$4 sm:$0xff]  }
 0x181   :  { %1412 = vmatprep.subr.bf16.mxu1 %v4196_v49  ;;  %v4241_v49 = vld [vmem:[%s5444_s10 + $0x134] ss:$8 sps:$4 sm:$0xff]  }
 0x184   :  { %1413 = vmatpush1.bf16.msra.mxu1 %v4194_v50  ;;  %v4239_v50 = vld [vmem:[%s5444_s10 + $0x130] ss:$8 sps:$4 sm:$0xff]  }
 0x185   :  { %1414 = vmatprep.subr.bf16.mxu1 %v4199_v51  ;;  %v4244_v51 = vld [vmem:[%s5444_s10 + $0x144] ss:$8 sps:$4 sm:$0xff]  }
 0x246   :  { %v3808_v60 = vpop.f32.mrb[4].mxu1 }
 0x247   :  { %v864_v62 = vmul.f32 %v3808_v60, %v3192_v59  ;;  %v836_v63 = vpop.f32.mrb[5].mxu1  ;;  %v4255_v60 = vld [vmem:[%s5447_s13 + $0x48] sm:$0xff]  }
 0x248   :  { %v862_v0 = vmul.f32 %v3192_v59, %v836_v63  ;;  %v3809_v1 = vpop.f32.mrb[6].mxu1  ;;  %v3250_v63 = vld [vmem:[%s5480_s26] ss:$0 sm:$0xff] }
 0x249   :  { %v875_v3 = vadd.f32 %v3193_v61, %v864_v62  ;;  %v865_v4 = vmul.f32 %v3809_v1, %v3192_v59  ;;  %v839_v5 = vpop.f32.mrb[7].mxu1  ;;  %v4257_v62 = vld [vmem:[%s5447_s13 + $0x58] sm:$0xff]   ;;  %v3251_v1 = vld [vmem:[%s5443_s9] ss:$0 sm:$0xff] }
 0x24a   :  { %v873_v6 = vadd.f32 %v3193_v61, %v862_v0  ;;  %v863_v7 = vmul.f32 %v3192_v59, %v839_v5  ;;  %v4254_v59 = vld [vmem:[%s5447_s13 + $0x40] sm:$0xff]  }
 0x24b   :  { %v879_v8 = vmax.f32 %v875_v3, 0.0  ;;  %v876_v9 = vadd.f32 %v3193_v61, %v865_v4 }
 0x24c   :  { %v877_v10 = vmax.f32 %v873_v6, 0.0  ;;  %v874_v11 = vadd.f32 %v3193_v61, %v863_v7  ;;  %v4256_v61 = vld [vmem:[%s5447_s13 + $0x50] sm:$0xff]  }
 0x24d   :  { %883 = vst [vmem:[#allocation2 + $0x19] sm:$0xff] %v879_v8  ;;  %v880_v13 = vmax.f32 %v876_v9, 0.0 }
 0x24e   :  { %881 = vst [vmem:[#allocation2 + $0x1] sm:$0xff] %v877_v10  ;;  %v878_v15 = vmax.f32 %v874_v11, 0.0 }
 0x24f   :  { %884 = vst [vmem:[#allocation2 + $0x21] sm:$0xff] %v880_v13  ;;  %v929_v18 = vpack.c.bf16 %v880_v13, %v879_v8 }
 0x250   :  { %882 = vst [vmem:[#allocation2 + $0x9] sm:$0xff] %v878_v15  ;;  %v928_v19 = vpack.c.bf16 %v878_v15, %v877_v10 }
 0x252   :  { %3826 = vmatprep.mubr.bf16.mxu0 %v928_v19 }
 0x253   :  { %3827 = vmatmul.mubr.bf16.vlgmr.msra.gmra.mrb[4].mxu0 %v929_v18 }
 0x254   :  { %3831 = vmatpush3.bf16.msra.mxu0 %v4166_v52  ;;  %v887_v34 = vld [vmem:[#allocation2 + $0x18] sm:$0xff] }
 0x255   :  { %3832 = vmatprep.subr.bf16.mxu0 %v4167_v20  ;;  %v885_v22 = vld [vmem:[#allocation2] sm:$0xff]  ;;  %v4197_v52 = vld [vmem:[%s5444_s10 + $0xd0] ss:$8 sps:$4 sm:$0xff]  }
 0x256   :  { %v888_v31 = vld [vmem:[#allocation2 + $0x20] sm:$0xff]  ;;  %1415 = vmatpush1.bf16.msra.mxu1 %v4197_v52 }
 0x257   :  { %v886_v23 = vld [vmem:[#allocation2 + $0x8] sm:$0xff]  ;;  %v906_v35 = vpack.c.bf16 %v888_v31, %v887_v34  ;;  %v1126_v44 = vld [vmem:[#allocation2 + $0x1a] sm:$0xff]  ;;  %1416 = vmatprep.subr.bf16.mxu1 %v4202_v53 }
 0x258   :  { %v905_v24 = vpack.c.bf16 %v886_v23, %v885_v22  ;;  %3833 = vmatpush3.bf16.msra.mxu0 %v4167_v20  ;;  %v1124_v32 = vld [vmem:[#allocation2 + $0x2] sm:$0xff]  ;;  %v1125_v33 = vld [vmem:[#allocation2 + $0xa] sm:$0xff]  ;;  %v4223_v34 = vld [vmem:[%s5444_s10 + $0x54] ss:$8 sps:$4 sm:$0xff]  }
 0x259   :  { %3834 = vmatprep.subr.bf16.mxu0 %v4168_v21  ;;  %v1145_v37 = vpack.c.bf16 %v1125_v33, %v1124_v32  ;;  %v1127_v45 = vld [vmem:[#allocation2 + $0x22] sm:$0xff]  ;;  %v4215_v31 = vld [vmem:[%s5444_s10 + $0x30] ss:$8 sps:$4 sm:$0xff]   ;;  %v4247_v53 = vld [vmem:[%s5444_s10 + $0x154] ss:$8 sps:$4 sm:$0xff]  }
 0x25a   :  { %3846 = vmatprep.mubr.bf16.mxu0 %v905_v24  ;;  %v1146_v46 = vpack.c.bf16 %v1127_v45, %v1126_v44  ;;  %1417 = vmatpush1.bf16.msra.mxu1 %v4200_v54  ;;  %v4220_v32 = vld [vmem:[%s5444_s10 + $0x44] ss:$8 sps:$4 sm:$0xff]   ;;  %v4218_v33 = vld [vmem:[%s5444_s10 + $0x40] ss:$8 sps:$4 sm:$0xff]   ;;  %v4235_v45 = vld [vmem:[%s5444_s10 + $0x114] ss:$8 sps:$4 sm:$0xff]  }
 0x25b   :  { %1418 = vmatprep.subr.bf16.mxu1 %v4205_v55  ;;  %v4242_v52 = vld [vmem:[%s5444_s10 + $0x140] ss:$8 sps:$4 sm:$0xff]   ;;  %v4245_v54 = vld [vmem:[%s5444_s10 + $0x150] ss:$8 sps:$4 sm:$0xff]   ;;  %v4250_v55 = vld [vmem:[%s5444_s10 + $0x164] ss:$8 sps:$4 sm:$0xff]  }
 0x25c   :  { %3835 = vmatpush3.bf16.msra.mxu0 %v4168_v21 }
 0x25d   :  { %3836 = vmatprep.subr.bf16.mxu0 %v4169_v25 }
 0x25e   :  { %1419 = vmatpush1.bf16.msra.mxu1 %v4203_v56  ;;  %v4248_v56 = vld [vmem:[%s5444_s10 + $0x160] ss:$8 sps:$4 sm:$0xff]  }
 0x25f   :  { %1527 = vmatprep.subr.bf16.mxu1 %v4208_v58  ;;  %v4253_v58 = vld [vmem:[%s5444_s10 + $0x174] ss:$8 sps:$4 sm:$0xff]  }
 0x260   :  { %3837 = vmatpush3.bf16.msra.mxu0 %v4169_v25 }
 0x261   :  { %3838 = vmatprep.subr.bf16.mxu0 %v4170_v26 }
 0x264   :  { %3839 = vmatpush3.bf16.msra.mxu0 %v4170_v26 }
 0x265   :  { %3840 = vmatprep.subr.bf16.mxu0 %v4171_v27 }
 0x268   :  { %3841 = vmatpush3.bf16.msra.mxu0 %v4171_v27 }
 0x269   :  { %3842 = vmatprep.subr.bf16.mxu0 %v4172_v28 }
 0x26c   :  { %3843 = vmatpush3.bf16.msra.mxu0 %v4172_v28  ;;  %v4214_v28 = vld [vmem:[%s5444_s10 + $0x24] ss:$8 sps:$4 sm:$0xff]  }
 0x26d   :  { %3844 = vmatprep.subr.bf16.mxu0 %v4173_v29 }
 0x270   :  { %3845 = vmatpush3.bf16.msra.mxu0 %v4173_v29  ;;  %v4212_v29 = vld [vmem:[%s5444_s10 + $0x20] ss:$8 sps:$4 sm:$0xff]  }
 0x271   :  { %3850 = vmatprep.subr.bf16.mxu0 %v4174_v30 }
 0x273   :  { %3847 = vmatmul.mubr.bf16.vlgmr.msra.gmra.mrb[4].mxu0 %v906_v35  ;;  %v4221_v35 = vld [vmem:[%s5444_s10 + $0x50] ss:$8 sps:$4 sm:$0xff]  }
 0x274   :  { %3851 = vmatpush3.bf16.msra.mxu0 %v4174_v30  ;;  %3866 = vmatprep.mubr.bf16.mxu0 %v1145_v37  ;;  %v4217_v30 = vld [vmem:[%s5444_s10 + $0x34] ss:$8 sps:$4 sm:$0xff]   ;;  %v4224_v37 = vld [vmem:[%s5444_s10 + $0x60] ss:$8 sps:$4 sm:$0xff]  }
 0x275   :  { %3852 = vmatprep.subr.bf16.mxu0 %v4175_v36 }
 0x278   :  { %3853 = vmatpush3.bf16.msra.mxu0 %v4175_v36  ;;  %v4226_v36 = vld [vmem:[%s5444_s10 + $0x64] ss:$8 sps:$4 sm:$0xff]  }
 0x279   :  { %3854 = vmatprep.subr.bf16.mxu0 %v4176_v38 }
 0x27c   :  { %3855 = vmatpush3.bf16.msra.mxu0 %v4176_v38  ;;  %v4229_v38 = vld [vmem:[%s5444_s10 + $0x74] ss:$8 sps:$4 sm:$0xff]  }
 0x27d   :  { %3856 = vmatprep.subr.bf16.mxu0 %v4177_v39 }
 0x280   :  { %3857 = vmatpush3.bf16.msra.mxu0 %v4177_v39  ;;  %v4227_v39 = vld [vmem:[%s5444_s10 + $0x70] ss:$8 sps:$4 sm:$0xff]  }
 0x281   :  { %3858 = vmatprep.subr.bf16.mxu0 %v4178_v40 }
 0x284   :  { %3859 = vmatpush3.bf16.msra.mxu0 %v4178_v40  ;;  %v4232_v40 = vld [vmem:[%s5444_s10 + $0x104] ss:$8 sps:$4 sm:$0xff]  }
 0x285   :  { %3860 = vmatprep.subr.bf16.mxu0 %v4179_v41 }
 0x288   :  { %3861 = vmatpush3.bf16.msra.mxu0 %v4179_v41 }
 0x289   :  { %3862 = vmatprep.subr.bf16.mxu0 %v4180_v42 }
 0x28c   :  { %3863 = vmatpush3.bf16.msra.mxu0 %v4180_v42 }
 0x28d   :  { %3864 = vmatprep.subr.bf16.mxu0 %v4181_v43 }
 0x290   :  { %3865 = vmatpush3.bf16.msra.mxu0 %v4181_v43  ;;  %v4230_v43 = vld [vmem:[%s5444_s10 + $0x100] ss:$8 sps:$4 sm:$0xff]  }
 0x291   :  { %3870 = vmatprep.subr.bf16.mxu0 %v4401_v2 }
 0x293   :  { %3867 = vmatmul.mubr.bf16.vlgmr.msra.gmra.mrb[4].mxu0 %v1146_v46  ;;  %v4233_v46 = vld [vmem:[%s5444_s10 + $0x110] ss:$8 sps:$4 sm:$0xff]  }
 0x294   :  { %3871 = vmatpush3.bf16.msra.mxu0 %v4254_v59  ;;  %v4251_v59 = vld [vmem:[%s5444_s10 + $0x170] ss:$8 sps:$4 sm:$0xff]   ;;  %3886 = vmatprep.mubr.msk.bf16.mxu0 %vm4403_vm0, %v4401_v2 }
 0x295   :  { %3872 = vmatprep.subr.bf16.mxu0 %v4401_v2 }
 0x298   :  { %3873 = vmatpush3.bf16.msra.mxu0 %v4255_v60 }
 0x299   :  { %3874 = vmatprep.subr.bf16.mxu0 %v4401_v2 }
 0x29c   :  { %3875 = vmatpush3.bf16.msra.mxu0 %v4256_v61 }
 0x29d   :  { %3876 = vmatprep.subr.bf16.mxu0 %v4401_v2 }
 0x2a0   :  { %3877 = vmatpush3.bf16.msra.mxu0 %v4257_v62 }
 0x2a1   :  { %3878 = vmatprep.subr.bf16.mxu0 %v4401_v2 }
 0x366   :  { %v3868_v0 = vpop.f32.mrb[4].mxu0 }
 0x367   :  { %v1257_v3 = vmul.f32 %v3868_v0, %v3250_v63  ;;  %v1229_v4 = vpop.f32.mrb[5].mxu0  ;;  %v4259_v0 = vld [vmem:[%s5447_s13 + $0x68] sm:$0xff]  }
 0x368   :  { %v1255_v5 = vmul.f32 %v3250_v63, %v1229_v4  ;;  %v3869_v6 = vpop.f32.mrb[6].mxu0  ;;  %v4278_v4 = vld [vmem:[%s5450_s16 + $0x80] ss:$8 sps:$4 sm:$0xff]  }
 0x369   :  { %v1268_v7 = vadd.f32 %v3251_v1, %v1257_v3  ;;  %v1258_v8 = vmul.f32 %v3869_v6, %v3250_v63  ;;  %v1232_v9 = vpop.f32.mrb[7].mxu0  ;;  %v4261_v3 = vld [vmem:[%s5447_s13 + $0x78] sm:$0xff]  }
 0x36a   :  { %v1266_v10 = vadd.f32 %v3251_v1, %v1255_v5  ;;  %v1256_v11 = vmul.f32 %v3250_v63, %v1232_v9  ;;  %v4258_v63 = vld [vmem:[%s5447_s13 + $0x60] sm:$0xff]   ;;  %v4283_v6 = vld [vmem:[%s5450_s16 + $0x94] ss:$8 sps:$4 sm:$0xff]  }
 0x36b   :  { %v1272_v13 = vadd.f32 %v1268_v7, %v4673_v12  ;;  %v1269_v15 = vadd.f32 %v3251_v1, %v1258_v8  ;;  %v4206_v12 = vld [vmem:[%s5444_s10] ss:$8 sps:$4 sm:$0xff]   ;;  %3879 = vmatpush3.bf16.msra.mxu0 %v4258_v63  ;;  %v4280_v5 = vld [vmem:[%s5450_s16 + $0x84] ss:$8 sps:$4 sm:$0xff]   ;;  %v4281_v7 = vld [vmem:[%s5450_s16 + $0x90] ss:$8 sps:$4 sm:$0xff]  }
 0x36c   :  { %v1270_v18 = vadd.f32 %v1266_v10, %v4675_v14  ;;  %v1267_v19 = vadd.f32 %v3251_v1, %v1256_v11  ;;  %3880 = vmatprep.subr.bf16.mxu0 %v4401_v2  ;;  %v4260_v1 = vld [vmem:[%s5447_s13 + $0x70] sm:$0xff]   ;;  %v4286_v8 = vld [vmem:[%s5450_s16 + $0xa4] ss:$8 sps:$4 sm:$0xff]   ;;  %v4284_v9 = vld [vmem:[%s5450_s16 + $0xa0] ss:$8 sps:$4 sm:$0xff]   ;;  %v1721_v10 = vlaneseq }
 0x36d   :  { %v1276_v20 = vmax.f32 %v1272_v13, 0.0  ;;  %v1273_v21 = vadd.f32 %v1269_v15, %v4678_v16  ;;  %v4211_v16 = vld [vmem:[%s5444_s10 + $0x14] ss:$8 sps:$4 sm:$0xff]   ;;  %v1719_v15 = vld [vmem:[%s5445_s11] sm:$0x3] }
 0x36e   :  { %v1274_v22 = vmax.f32 %v1270_v18, 0.0  ;;  %v1271_v23 = vadd.f32 %v1267_v19, %v4681_v17  ;;  %v4209_v17 = vld [vmem:[%s5444_s10 + $0x10] ss:$8 sps:$4 sm:$0xff]   ;;  %v1722_v11 = vshrl.u32 %v1721_v10, 7  ;;  %v1735_v19 = vld [vmem:[%s5446_s12] sm:$0x3] }
 0x36f   :  { %1280 = vst [vmem:[#allocation2 + $0x19] sm:$0xff] %v1276_v20  ;;  %v1277_v24 = vmax.f32 %v1273_v21, 0.0  ;;  %3881 = vmatpush3.bf16.msra.mxu0 %v4259_v0  ;;  %v4293_v63 = vld [vmem:[%s5450_s16 + $0xd0] ss:$8 sps:$4 sm:$0xff]   ;;  %v4296_v0 = vld [vmem:[%s5450_s16 + $0xe0] ss:$8 sps:$4 sm:$0xff]  }
 0x370   :  { %1278 = vst [vmem:[#allocation2 + $0x1] sm:$0xff] %v1274_v22  ;;  %v1275_v25 = vmax.f32 %v1271_v23, 0.0  ;;  %3882 = vmatprep.subr.bf16.mxu0 %v4401_v2  ;;  %v5014_v13 = vsub.s32 0, %v1722_v11  ;;  %v5019_v18 = vsub.s32 1, %v1722_v11  ;;  %v3389_v11 = vld [vmem:[%s5449_s15] ss:$0 sm:$0xff] }
 0x371   :  { %1281 = vst [vmem:[#allocation2 + $0x21] sm:$0xff] %v1277_v24 }
 0x372   :  { %1279 = vst [vmem:[#allocation2 + $0x9] sm:$0xff] %v1275_v25  ;;  %v1724_v20 = vrot.slane %v1719_v15, %v5014_v13  ;;  %v1728_v21 = vrot.slane %v1719_v15, %v5019_v18  ;;  %v1740_v22 = vrot.slane %v1735_v19, %v5014_v13  ;;  %v1744_v24 = vrot.slane %v1735_v19, %v5019_v18 }
 0x373   :  { %3883 = vmatpush3.bf16.msra.mxu0 %v4260_v1  ;;  %v4298_v1 = vld [vmem:[%s5450_s16 + $0xe4] ss:$8 sps:$4 sm:$0xff]  }
 0x374   :  { %3884 = vmatprep.subr.bf16.mxu0 %v4401_v2 }
 0x377   :  { %3885 = vmatpush3.bf16.msra.mxu0 %v4261_v3  ;;  %v4301_v3 = vld [vmem:[%s5450_s16 + $0xf4] ss:$8 sps:$4 sm:$0xff]  }
 0x378   :  { %v1305_v26 = vld [vmem:[#allocation2 + $0x19] ss:$2 sm:$0xff]  ;;  %v1284_v42 = vld [vmem:[#allocation2 + $0x18] ss:$2 sm:$0xff]  ;;  %3890 = vmatprep.subr.bf16.mxu0 %v4401_v2 }
 0x379   :  { %v1303_v27 = vld [vmem:[#allocation2 + $0x1] ss:$2 sm:$0xff]  ;;  %v1282_v41 = vld [vmem:[#allocation2] ss:$2 sm:$0xff] }
 0x37a   :  { %v1323_v14 = vpack.c.bf16 %v1305_v26, %v1303_v27  ;;  %v1301_v44 = vpack.c.bf16 %v1284_v42, %v1282_v41  ;;  %v1571_v60 = vld [vmem:[#allocation2 + $0x2] ss:$2 sm:$0xff]  ;;  %v4269_v42 = vld [vmem:[%s5447_s13 + $0x38] sm:$0xff]  }
 0x37b   :  { %v1573_v61 = vld [vmem:[#allocation2 + $0x1a] ss:$2 sm:$0xff]  ;;  %v4268_v41 = vld [vmem:[%s5447_s13 + $0x30] sm:$0xff]  }
 0x37c   :  { %1437 = vmatmul.mubr.bf16.vlgmr.msra.gmra.mrb[8].mxu1 %v1323_v14  ;;  %v1591_v62 = vpack.c.bf16 %v1573_v61, %v1571_v60  ;;  %v4292_v60 = vld [vmem:[%s5450_s16 + $0xc4] ss:$8 sps:$4 sm:$0xff]   ;;  %v4290_v61 = vld [vmem:[%s5450_s16 + $0xc0] ss:$8 sps:$4 sm:$0xff]  }
 0x37d   :  { %1528 = vmatpush1.bf16.msra.mxu1 %v4206_v12  ;;  %1559 = vmatprep.mubr.bf16.mxu1 %v4402_v57 }
 0x37e   :  { %1529 = vmatprep.subr.bf16.mxu1 %v4211_v16 }
 0x381   :  { %1530 = vmatpush1.bf16.msra.mxu1 %v4209_v17 }
 0x382   :  { %1531 = vmatprep.subr.bf16.mxu1 %v4214_v28 }
 0x385   :  { %1532 = vmatpush1.bf16.msra.mxu1 %v4212_v29 }
 0x386   :  { %1533 = vmatprep.subr.bf16.mxu1 %v4217_v30 }
 0x389   :  { %1534 = vmatpush1.bf16.msra.mxu1 %v4215_v31 }
 0x38a   :  { %1535 = vmatprep.subr.bf16.mxu1 %v4220_v32 }
 0x38d   :  { %1536 = vmatpush1.bf16.msra.mxu1 %v4218_v33 }
 0x38e   :  { %1537 = vmatprep.subr.bf16.mxu1 %v4223_v34  ;;  %v4262_v34 = vld [vmem:[%s5447_s13] sm:$0xff]  }
 0x391   :  { %1538 = vmatpush1.bf16.msra.mxu1 %v4221_v35 }
 0x392   :  { %1539 = vmatprep.subr.bf16.mxu1 %v4226_v36  ;;  %v4263_v36 = vld [vmem:[%s5447_s13 + $0x8] sm:$0xff]  }
 0x395   :  { %1540 = vmatpush1.bf16.msra.mxu1 %v4224_v37  ;;  %v4264_v37 = vld [vmem:[%s5447_s13 + $0x10] sm:$0xff]  }
 0x396   :  { %1541 = vmatprep.subr.bf16.mxu1 %v4229_v38  ;;  %v4265_v38 = vld [vmem:[%s5447_s13 + $0x18] sm:$0xff]  }
 0x399   :  { %1542 = vmatpush1.bf16.msra.mxu1 %v4227_v39  ;;  %v4266_v39 = vld [vmem:[%s5447_s13 + $0x20] sm:$0xff]  }
 0x39a   :  { %1672 = vmatprep.subr.bf16.mxu1 %v4232_v40  ;;  %v4267_v40 = vld [vmem:[%s5447_s13 + $0x28] sm:$0xff]  }
 0x39c   :  { %1560 = vmatmul.mubr.bf16.vlgmr.msra.gmra.mrb[8].mxu1 %v1301_v44 }
 0x39d   :  { %1673 = vmatpush1.bf16.msra.mxu1 %v4230_v43  ;;  %1704 = vmatprep.mubr.bf16.mxu1 %v4402_v57 }
 0x39e   :  { %1674 = vmatprep.subr.bf16.mxu1 %v4235_v45  ;;  %v4270_v45 = vld [vmem:[%s5447_s13 + $0x80] sm:$0xff]  }
 0x3a1   :  { %1675 = vmatpush1.bf16.msra.mxu1 %v4233_v46 }
 0x3a2   :  { %1676 = vmatprep.subr.bf16.mxu1 %v4238_v47  ;;  %v4271_v47 = vld [vmem:[%s5447_s13 + $0x88] sm:$0xff]  }
 0x3a5   :  { %1677 = vmatpush1.bf16.msra.mxu1 %v4236_v48  ;;  %v4272_v48 = vld [vmem:[%s5447_s13 + $0x90] sm:$0xff]  }
 0x3a6   :  { %1678 = vmatprep.subr.bf16.mxu1 %v4241_v49  ;;  %v4273_v49 = vld [vmem:[%s5447_s13 + $0x98] sm:$0xff]  }
 0x3a9   :  { %1679 = vmatpush1.bf16.msra.mxu1 %v4239_v50  ;;  %v4274_v50 = vld [vmem:[%s5447_s13 + $0xa0] sm:$0xff]  }
 0x3aa   :  { %1680 = vmatprep.subr.bf16.mxu1 %v4244_v51  ;;  %v4275_v51 = vld [vmem:[%s5447_s13 + $0xa8] sm:$0xff]  }
 0x3ad   :  { %1681 = vmatpush1.bf16.msra.mxu1 %v4242_v52  ;;  %v4276_v52 = vld [vmem:[%s5447_s13 + $0xb0] sm:$0xff]  }
 0x3ae   :  { %1682 = vmatprep.subr.bf16.mxu1 %v4247_v53  ;;  %v4277_v53 = vld [vmem:[%s5447_s13 + $0xb8] sm:$0xff]  }
 0x3b1   :  { %1683 = vmatpush1.bf16.msra.mxu1 %v4245_v54 }
 0x3b2   :  { %1684 = vmatprep.subr.bf16.mxu1 %v4250_v55 }
 0x3b5   :  { %1685 = vmatpush1.bf16.msra.mxu1 %v4248_v56 }
 0x3b6   :  { %1686 = vmatprep.subr.bf16.mxu1 %v4253_v58  ;;  %v4289_v58 = vld [vmem:[%s5450_s16 + $0xb4] ss:$8 sps:$4 sm:$0xff]  }
 0x3b9   :  { %1687 = vmatpush1.bf16.msra.mxu1 %v4251_v59  ;;  %v4287_v59 = vld [vmem:[%s5450_s16 + $0xb0] ss:$8 sps:$4 sm:$0xff]  }
 0x3ba   :  { %2237 = vmatprep.subr.bf16.mxu1 %v4280_v5  ;;  %v4304_v5 = vld [vmem:[%s5450_s16 + $0x4] ss:$8 sps:$4 sm:$0xff]  }
 0x3bc   :  { %1705 = vmatmul.mubr.bf16.vlgmr.msra.gmra.mrb[8].mxu1 %v1591_v62  ;;  %v4295_v62 = vld [vmem:[%s5450_s16 + $0xd4] ss:$8 sps:$4 sm:$0xff]  }
 0x3bd   :  { %2269 = vmatprep.mubr.bf16.mxu1 %v4402_v57  ;;  %2238 = vmatpush1.bf16.msra.mxu1 %v4278_v4  ;;  %v4299_v4 = vld [vmem:[%s5450_s16 + $0xf0] ss:$8 sps:$4 sm:$0xff]  }
 0x3be   :  { %2239 = vmatprep.subr.bf16.mxu1 %v4283_v6  ;;  %v4350_v6 = vld [vmem:[%s5453_s19 + $0x40] sm:$0xff]  }
 0x3c1   :  { %2240 = vmatpush1.bf16.msra.mxu1 %v4281_v7  ;;  %v4351_v7 = vld [vmem:[%s5453_s19 + $0x48] sm:$0xff]  }
 0x3c2   :  { %2241 = vmatprep.subr.bf16.mxu1 %v4286_v8  ;;  %v4352_v8 = vld [vmem:[%s5453_s19 + $0x50] sm:$0xff]  }
 0x3c5   :  { %2242 = vmatpush1.bf16.msra.mxu1 %v4284_v9  ;;  %v3388_v9 = vld [vmem:[%s5448_s14] ss:$0 sm:$0xff] }
 0x3c6   :  { %2243 = vmatprep.subr.bf16.mxu1 %v4289_v58  ;;  %v4343_v58 = vld [vmem:[%s5450_s16 + $0x154] ss:$8 sps:$4 sm:$0xff]  }
 0x3c9   :  { %2244 = vmatpush1.bf16.msra.mxu1 %v4287_v59  ;;  %v4341_v59 = vld [vmem:[%s5450_s16 + $0x150] ss:$8 sps:$4 sm:$0xff]  }
 0x3ca   :  { %2245 = vmatprep.subr.bf16.mxu1 %v4292_v60  ;;  %v4346_v60 = vld [vmem:[%s5450_s16 + $0x164] ss:$8 sps:$4 sm:$0xff]  }
 0x3cd   :  { %2246 = vmatpush1.bf16.msra.mxu1 %v4290_v61  ;;  %v4344_v61 = vld [vmem:[%s5450_s16 + $0x160] ss:$8 sps:$4 sm:$0xff]  }
 0x3ce   :  { %2247 = vmatprep.subr.bf16.mxu1 %v4295_v62  ;;  %v4349_v62 = vld [vmem:[%s5450_s16 + $0x174] ss:$8 sps:$4 sm:$0xff]  }
 0x3d1   :  { %2248 = vmatpush1.bf16.msra.mxu1 %v4293_v63 }
 0x3d2   :  { %2249 = vmatprep.subr.bf16.mxu1 %v4298_v1 }
 0x3d5   :  { %2250 = vmatpush1.bf16.msra.mxu1 %v4296_v0  ;;  %v4347_v0 = vld [vmem:[%s5450_s16 + $0x170] ss:$8 sps:$4 sm:$0xff]  }
 0x3d6   :  { %2251 = vmatprep.subr.bf16.mxu1 %v4301_v3 }
 0x3d9   :  { %2252 = vmatpush1.bf16.msra.mxu1 %v4299_v4 }
 0x3da   :  { %2358 = vmatprep.subr.bf16.mxu1 %v4304_v5  ;;  %v4353_v5 = vld [vmem:[%s5453_s19 + $0x58] sm:$0xff]  }
 0x48f   :  { %v1706_v23 = vpop.f32.mrb[8].mxu1 }
 0x490   :  { %v1731_v25 = vmul.f32 %v1724_v20, %v1706_v23  ;;  %v1708_v26 = vpop.f32.mrb[9].mxu1 }
 0x491   :  { %v1732_v12 = vmul.f32 %v1728_v21, %v1708_v26  ;;  %v1710_v27 = vpop.f32.mrb[10].mxu1 }
 0x492   :  { %v1747_v14 = vadd.f32 %v1740_v22, %v1731_v25  ;;  %v1733_v16 = vmul.f32 %v1724_v20, %v1710_v27  ;;  %v1712_v17 = vpop.f32.mrb[11].mxu1 }
 0x493   :  { %v5028_v28 = vadd.f32 %v1744_v24, %v1732_v12  ;;  %v1734_v29 = vmul.f32 %v1728_v21, %v1712_v17 }
 0x494   :  { %v1751_v30 = vmax.f32 %v1747_v14, 0.0  ;;  %v1749_v31 = vadd.f32 %v1740_v22, %v1733_v16 }
 0x495   :  { %v5030_v32 = vadd.f32 %v1744_v24, %v1734_v29  ;;  %v4302_v29 = vld [vmem:[%s5450_s16] ss:$8 sps:$4 sm:$0xff]  }
 0x496   :  { %1753 = vst [vmem:[#allocation3 + $0x1] sm:$0xff] %v1751_v30  ;;  %v1752_v33 = vmax.f32 %v1749_v31, 0.0  ;;  %v4307_v31 = vld [vmem:[%s5450_s16 + $0x14] ss:$8 sps:$4 sm:$0xff]  }
 0x498   :  { %1754 = vst [vmem:[#allocation3 + $0x11] sm:$0xff] %v1752_v33  ;;  %v1793_v35 = vpack.c.bf16 %v1752_v33, %v1751_v30  ;;  %v4308_v33 = vld [vmem:[%s5450_s16 + $0x20] ss:$8 sps:$4 sm:$0xff]  }
 0x49a   :  { %3887 = vmatmul.mubr.bf16.vlgmr.msra.gmra.mrb[8].mxu0 %v1793_v35  ;;  %v4311_v35 = vld [vmem:[%s5450_s16 + $0x30] ss:$8 sps:$4 sm:$0xff]  }
 0x49b   :  { %3891 = vmatpush3.bf16.msra.mxu0 %v4262_v34  ;;  %3906 = vmatprep.mubr.msk.bf16.mxu0 %vm4403_vm0, %v4401_v2  ;;  %v4313_v34 = vld [vmem:[%s5450_s16 + $0x34] ss:$8 sps:$4 sm:$0xff]  }
 0x49c   :  { %3892 = vmatprep.subr.bf16.mxu0 %v4401_v2 }
 0x49d   :  { %v1755_v44 = vld [vmem:[#allocation3] sm:$0xff] }
 0x49e   :  { %v1972_v55 = vld [vmem:[#allocation3 + $0x2] sm:$0xff] }
 0x49f   :  { %3893 = vmatpush3.bf16.msra.mxu0 %v4263_v36  ;;  %v1756_v43 = vld [vmem:[#allocation3 + $0x10] sm:$0xff] }
 0x4a0   :  { %3894 = vmatprep.subr.bf16.mxu0 %v4401_v2  ;;  %v1773_v46 = vpack.c.bf16 %v1756_v43, %v1755_v44  ;;  %v1973_v54 = vld [vmem:[#allocation3 + $0x12] sm:$0xff]  ;;  %v4323_v44 = vld [vmem:[%s5450_s16 + $0x70] ss:$8 sps:$4 sm:$0xff]  }
 0x4a1   :  { %v1991_v56 = vpack.c.bf16 %v1973_v54, %v1972_v55  ;;  %v4316_v36 = vld [vmem:[%s5450_s16 + $0x44] ss:$8 sps:$4 sm:$0xff]   ;;  %v4337_v54 = vld [vmem:[%s5450_s16 + $0x134] ss:$8 sps:$4 sm:$0xff]  }
 0x4a2   :  { %v4340_v55 = vld [vmem:[%s5450_s16 + $0x144] ss:$8 sps:$4 sm:$0xff]  }
 0x4a3   :  { %3895 = vmatpush3.bf16.msra.mxu0 %v4264_v37  ;;  %v4314_v37 = vld [vmem:[%s5450_s16 + $0x40] ss:$8 sps:$4 sm:$0xff]  }
 0x4a4   :  { %3896 = vmatprep.subr.bf16.mxu0 %v4401_v2 }
 0x4a7   :  { %3897 = vmatpush3.bf16.msra.mxu0 %v4265_v38  ;;  %v4319_v38 = vld [vmem:[%s5450_s16 + $0x54] ss:$8 sps:$4 sm:$0xff]  }
 0x4a8   :  { %3898 = vmatprep.subr.bf16.mxu0 %v4401_v2 }
 0x4ab   :  { %3899 = vmatpush3.bf16.msra.mxu0 %v4266_v39  ;;  %v4317_v39 = vld [vmem:[%s5450_s16 + $0x50] ss:$8 sps:$4 sm:$0xff]  }
 0x4ac   :  { %3900 = vmatprep.subr.bf16.mxu0 %v4401_v2 }
 0x4af   :  { %3901 = vmatpush3.bf16.msra.mxu0 %v4267_v40  ;;  %v4322_v40 = vld [vmem:[%s5450_s16 + $0x64] ss:$8 sps:$4 sm:$0xff]  }
 0x4b0   :  { %3902 = vmatprep.subr.bf16.mxu0 %v4401_v2 }
 0x4b3   :  { %3903 = vmatpush3.bf16.msra.mxu0 %v4268_v41  ;;  %v4320_v41 = vld [vmem:[%s5450_s16 + $0x60] ss:$8 sps:$4 sm:$0xff]  }
 0x4b4   :  { %3904 = vmatprep.subr.bf16.mxu0 %v4401_v2 }
 0x4b7   :  { %3905 = vmatpush3.bf16.msra.mxu0 %v4269_v42  ;;  %v4325_v42 = vld [vmem:[%s5450_s16 + $0x74] ss:$8 sps:$4 sm:$0xff]  }
 0x4b8   :  { %3910 = vmatprep.subr.bf16.mxu0 %v4401_v2 }
 0x4ba   :  { %3907 = vmatmul.mubr.bf16.vlgmr.msra.gmra.mrb[8].mxu0 %v1773_v46 }
 0x4bb   :  { %3911 = vmatpush3.bf16.msra.mxu0 %v4270_v45  ;;  %3926 = vmatprep.mubr.msk.bf16.mxu0 %vm4403_vm0, %v4401_v2 }
 0x4bc   :  { %3912 = vmatprep.subr.bf16.mxu0 %v4401_v2 }
 0x4bf   :  { %3913 = vmatpush3.bf16.msra.mxu0 %v4271_v47  ;;  %v4328_v47 = vld [vmem:[%s5450_s16 + $0x104] ss:$8 sps:$4 sm:$0xff]  }
 0x4c0   :  { %3914 = vmatprep.subr.bf16.mxu0 %v4401_v2 }
 0x4c3   :  { %3915 = vmatpush3.bf16.msra.mxu0 %v4272_v48  ;;  %v4326_v48 = vld [vmem:[%s5450_s16 + $0x100] ss:$8 sps:$4 sm:$0xff]  }
 0x4c4   :  { %3916 = vmatprep.subr.bf16.mxu0 %v4401_v2 }
 0x4c7   :  { %3917 = vmatpush3.bf16.msra.mxu0 %v4273_v49 }
 0x4c8   :  { %3918 = vmatprep.subr.bf16.mxu0 %v4401_v2 }
 0x4cb   :  { %3919 = vmatpush3.bf16.msra.mxu0 %v4274_v50  ;;  %v4331_v50 = vld [vmem:[%s5450_s16 + $0x114] ss:$8 sps:$4 sm:$0xff]  }
 0x4cc   :  { %3920 = vmatprep.subr.bf16.mxu0 %v4401_v2 }
 0x4cf   :  { %3921 = vmatpush3.bf16.msra.mxu0 %v4275_v51  ;;  %v4329_v51 = vld [vmem:[%s5450_s16 + $0x110] ss:$8 sps:$4 sm:$0xff]  }
 0x4d0   :  { %3922 = vmatprep.subr.bf16.mxu0 %v4401_v2 }
 0x4d3   :  { %3923 = vmatpush3.bf16.msra.mxu0 %v4276_v52  ;;  %v4334_v52 = vld [vmem:[%s5450_s16 + $0x124] ss:$8 sps:$4 sm:$0xff]  }
 0x4d4   :  { %3924 = vmatprep.subr.bf16.mxu0 %v4401_v2 }
 0x4d7   :  { %3925 = vmatpush3.bf16.msra.mxu0 %v4277_v53  ;;  %v4332_v53 = vld [vmem:[%s5450_s16 + $0x120] ss:$8 sps:$4 sm:$0xff]  }
 0x4d8   :  { %3930 = vmatprep.subr.bf16.mxu0 %v4401_v2 }
 0x4da   :  { %3927 = vmatmul.mubr.bf16.vlgmr.msra.gmra.mrb[8].mxu0 %v1991_v56  ;;  %v4338_v56 = vld [vmem:[%s5450_s16 + $0x140] ss:$8 sps:$4 sm:$0xff]  }
 0x4db   :  { %3946 = vmatprep.mubr.msk.bf16.mxu0 %vm4403_vm0, %v4401_v2  ;;  %3931 = vmatpush3.bf16.msra.mxu0 %v4350_v6  ;;  %v4354_v6 = vld [vmem:[%s5453_s19 + $0x60] sm:$0xff]  }
 0x4dc   :  { %3932 = vmatprep.subr.bf16.mxu0 %v4401_v2 }
 0x4df   :  { %3933 = vmatpush3.bf16.msra.mxu0 %v4351_v7  ;;  %v4355_v7 = vld [vmem:[%s5453_s19 + $0x68] sm:$0xff]  }
 0x4e0   :  { %3934 = vmatprep.subr.bf16.mxu0 %v4401_v2 }
 0x4e3   :  { %3935 = vmatpush3.bf16.msra.mxu0 %v4352_v8  ;;  %v4356_v8 = vld [vmem:[%s5453_s19 + $0x70] sm:$0xff]  }
 0x4e4   :  { %3936 = vmatprep.subr.bf16.mxu0 %v4401_v2 }
 0x4e7   :  { %3937 = vmatpush3.bf16.msra.mxu0 %v4353_v5  ;;  %v2976_v5 = vld [vmem:[%s5456_s22 + $0x60] sm:$0xff] }
 0x4e8   :  { %3938 = vmatprep.subr.bf16.mxu0 %v4401_v2 }
 0x4eb   :  { %3939 = vmatpush3.bf16.msra.mxu0 %v4354_v6  ;;  %v2977_v6 = vld [vmem:[%s5456_s22 + $0x68] sm:$0xff] }
 0x4ec   :  { %3940 = vmatprep.subr.bf16.mxu0 %v4401_v2 }
 0x4ef   :  { %3941 = vmatpush3.bf16.msra.mxu0 %v4355_v7  ;;  %v4044_v7 = vpack.c.bf16 %v2977_v6, %v2976_v5 }
 0x4f0   :  { %3942 = vmatprep.subr.bf16.mxu0 %v4401_v2 }
 0x4f3   :  { %3943 = vmatpush3.bf16.msra.mxu0 %v4356_v8  ;;  %v2978_v8 = vld [vmem:[%s5456_s22 + $0x70] sm:$0xff] }
 0x4f4   :  { %3944 = vmatprep.subr.bf16.mxu0 %v4401_v2 }
 0x5ad   :  { %v2074_v10 = vpop.f32.mrb[8].mxu0 }
 0x5ae   :  { %v2090_v15 = vmul.f32 %v3388_v9, %v2074_v10  ;;  %v3928_v19 = vpop.f32.mrb[9].mxu0  ;;  %v2964_v10 = vld [vmem:[%s5456_s22] sm:$0xff] }
 0x5af   :  { %v2077_v20 = vpop.f32.mrb[10].mxu0  ;;  %v4404_v19 = vmov 0.0|0.0  }
 0x5b0   :  { %v2099_v21 = vadd.f32 %v3389_v11, %v2090_v15  ;;  %v2091_v22 = vmul.f32 %v3388_v9, %v2077_v20  ;;  %v3929_v23 = vpop.f32.mrb[11].mxu0  ;;  %v4357_v9 = vld [vmem:[%s5453_s19 + $0x78] sm:$0xff]   ;;  %v2966_v15 = vld [vmem:[%s5456_s22 + $0x10] sm:$0xff] }
 0x5b1   :  { %3945 = vmatpush3.bf16.msra.mxu0 %v4357_v9  ;;  %v2548_v23 = vld [vmem:[%s5451_s17] sm:$0x3]  ;;  %v2979_v9 = vld [vmem:[%s5456_s22 + $0x78] sm:$0xff] }
 0x5b2   :  { %v2101_v24 = vadd.f32 %v2099_v21, %v5028_v28  ;;  %v2100_v25 = vadd.f32 %v3389_v11, %v2091_v22  ;;  %v4305_v28 = vld [vmem:[%s5450_s16 + $0x10] ss:$8 sps:$4 sm:$0xff]   ;;  %3950 = vmatprep.subr.bf16.mxu0 %v4401_v2  ;;  %v2965_v11 = vld [vmem:[%s5456_s22 + $0x8] sm:$0xff] }
 0x5b3   :  { %v4026_v20 = vpack.c.bf16 %v2965_v11, %v2964_v10  ;;  %v2967_v21 = vld [vmem:[%s5456_s22 + $0x18] sm:$0xff]  ;;  %v4047_v10 = vpack.c.bf16 %v2979_v9, %v2978_v8  ;;  %v3526_v11 = vld [vmem:[%s5454_s20] ss:$0 sm:$0xff] }
 0x5b4   :  { %v2103_v26 = vmax.f32 %v2101_v24, 0.0  ;;  %v2102_v12 = vadd.f32 %v2100_v25, %v5030_v32  ;;  %v4310_v32 = vld [vmem:[%s5450_s16 + $0x24] ss:$8 sps:$4 sm:$0xff]   ;;  %v4029_v22 = vpack.c.bf16 %v2967_v21, %v2966_v15  ;;  %v2562_v24 = vld [vmem:[%s5452_s18] sm:$0x3]  ;;  %v2553_v25 = vrot.slane %v2548_v23, %v5014_v13 }
 0x5b6   :  { %2105 = vst [vmem:[#allocation3 + $0x1] sm:$0xff] %v2103_v26  ;;  %v2104_v27 = vmax.f32 %v2102_v12, 0.0  ;;  %v2557_v26 = vrot.slane %v2548_v23, %v5019_v18  ;;  %v2567_v12 = vrot.slane %v2562_v24, %v5014_v13 }
 0x5b8   :  { %2106 = vst [vmem:[#allocation3 + $0x11] sm:$0xff] %v2104_v27 }
 0x5bd   :  { %v2132_v14 = vld [vmem:[#allocation3 + $0x1] ss:$2 sm:$0xf]  ;;  %v2107_v45 = vld [vmem:[#allocation3] ss:$2 sm:$0xf] }
 0x5be   :  { %v2400_v1 = vld [vmem:[#allocation3 + $0x2] ss:$2 sm:$0xf] }
 0x5bf   :  { %v2134_v16 = vld [vmem:[#allocation3 + $0x11] ss:$2 sm:$0xf]  ;;  %v2109_v43 = vld [vmem:[#allocation3 + $0x10] ss:$2 sm:$0xf] }
 0x5c0   :  { %v2154_v17 = vcombine.low %v2132_v14, %v2134_v16  ;;  %v2128_v46 = vcombine.low %v2107_v45, %v2109_v43  ;;  %v2402_v63 = vld [vmem:[#allocation3 + $0x12] ss:$2 sm:$0xf]  ;;  %v2571_v14 = vrot.slane %v2562_v24, %v5019_v18  ;;  %v4365_v43 = vld [vmem:[%s5453_s19 + $0x30] sm:$0xff]  }
 0x5c1   :  { %v2422_v3 = vcombine.low %v2400_v1, %v2402_v63  ;;  %v4359_v18 = vld [vmem:[%s5453_s19] sm:$0xff]   ;;  %v2973_v63 = vld [vmem:[%s5456_s22 + $0x48] sm:$0xff]  ;;  %v2974_v1 = vld [vmem:[%s5456_s22 + $0x50] sm:$0xff] }
 0x5c2   :  { %v2156_v30 = vpack.c.bf16 %v2154_v17, %v2154_v17  ;;  %v2130_v49 = vpack.c.bf16 %v2128_v46, %v2128_v46  ;;  %v4368_v46 = vld [vmem:[%s5453_s19 + $0x80] sm:$0xff]  }
 0x5c3   :  { %v2424_v4 = vpack.c.bf16 %v2422_v3, %v2422_v3  ;;  %v2975_v3 = vld [vmem:[%s5456_s22 + $0x58] sm:$0xff] }
 0x5c4   :  { %2270 = vmatmul.mubr.bf16.vlgmr.msra.gmra.mrb[12].mxu1 %v2156_v30 }
 0x5c5   :  { %2359 = vmatpush1.bf16.msra.mxu1 %v4302_v29  ;;  %2390 = vmatprep.mubr.bf16.mxu1 %v4402_v57 }
 0x5c6   :  { %2360 = vmatprep.subr.bf16.mxu1 %v4307_v31 }
 0x5c9   :  { %2361 = vmatpush1.bf16.msra.mxu1 %v4305_v28 }
 0x5ca   :  { %2362 = vmatprep.subr.bf16.mxu1 %v4310_v32 }
 0x5cd   :  { %2363 = vmatpush1.bf16.msra.mxu1 %v4308_v33 }
 0x5ce   :  { %2364 = vmatprep.subr.bf16.mxu1 %v4313_v34 }
 0x5d1   :  { %2365 = vmatpush1.bf16.msra.mxu1 %v4311_v35 }
 0x5d2   :  { %2366 = vmatprep.subr.bf16.mxu1 %v4316_v36 }
 0x5d5   :  { %2367 = vmatpush1.bf16.msra.mxu1 %v4314_v37 }
 0x5d6   :  { %2368 = vmatprep.subr.bf16.mxu1 %v4319_v38  ;;  %v4360_v38 = vld [vmem:[%s5453_s19 + $0x8] sm:$0xff]  }
 0x5d9   :  { %2369 = vmatpush1.bf16.msra.mxu1 %v4317_v39  ;;  %v4361_v39 = vld [vmem:[%s5453_s19 + $0x10] sm:$0xff]  }
 0x5da   :  { %2370 = vmatprep.subr.bf16.mxu1 %v4322_v40  ;;  %v4362_v40 = vld [vmem:[%s5453_s19 + $0x18] sm:$0xff]  }
 0x5dd   :  { %2371 = vmatpush1.bf16.msra.mxu1 %v4320_v41  ;;  %v4363_v41 = vld [vmem:[%s5453_s19 + $0x20] sm:$0xff]  }
 0x5de   :  { %2372 = vmatprep.subr.bf16.mxu1 %v4325_v42  ;;  %v4364_v42 = vld [vmem:[%s5453_s19 + $0x28] sm:$0xff]  }
 0x5e1   :  { %2373 = vmatpush1.bf16.msra.mxu1 %v4323_v44  ;;  %v4366_v44 = vld [vmem:[%s5453_s19 + $0x38] sm:$0xff]  }
 0x5e2   :  { %2505 = vmatprep.subr.bf16.mxu1 %v4328_v47 }
 0x5e4   :  { %2391 = vmatmul.mubr.bf16.vlgmr.msra.gmra.mrb[12].mxu1 %v2130_v49  ;;  %v4370_v49 = vld [vmem:[%s5453_s19 + $0x90] sm:$0xff]  }
 0x5e5   :  { %2506 = vmatpush1.bf16.msra.mxu1 %v4326_v48  ;;  %2537 = vmatprep.mubr.bf16.mxu1 %v4402_v57  ;;  %v4335_v57 = vld [vmem:[%s5450_s16 + $0x130] ss:$8 sps:$4 sm:$0xff]   ;;  %v4369_v48 = vld [vmem:[%s5453_s19 + $0x88] sm:$0xff]  }
 0x5e6   :  { %2507 = vmatprep.subr.bf16.mxu1 %v4331_v50  ;;  %v4371_v50 = vld [vmem:[%s5453_s19 + $0x98] sm:$0xff]  }
 0x5e9   :  { %2508 = vmatpush1.bf16.msra.mxu1 %v4329_v51  ;;  %v4372_v51 = vld [vmem:[%s5453_s19 + $0xa0] sm:$0xff]  }
 0x5ea   :  { %2509 = vmatprep.subr.bf16.mxu1 %v4334_v52  ;;  %v4373_v52 = vld [vmem:[%s5453_s19 + $0xa8] sm:$0xff]  }
 0x5ed   :  { %2510 = vmatpush1.bf16.msra.mxu1 %v4332_v53  ;;  %v4374_v53 = vld [vmem:[%s5453_s19 + $0xb0] sm:$0xff]  }
 0x5ee   :  { %2511 = vmatprep.subr.bf16.mxu1 %v4337_v54  ;;  %v4375_v54 = vld [vmem:[%s5453_s19 + $0xb8] sm:$0xff]  }
 0x5f1   :  { %2512 = vmatpush1.bf16.msra.mxu1 %v4335_v57 }
 0x5f2   :  { %2513 = vmatprep.subr.bf16.mxu1 %v4340_v55 }
 0x5f5   :  { %2514 = vmatpush1.bf16.msra.mxu1 %v4338_v56  ;;  %v2968_v56 = vld [vmem:[%s5456_s22 + $0x20] sm:$0xff] }
 0x5f6   :  { %2515 = vmatprep.subr.bf16.mxu1 %v4343_v58  ;;  %v2969_v58 = vld [vmem:[%s5456_s22 + $0x28] sm:$0xff] }
 0x5f9   :  { %2516 = vmatpush1.bf16.msra.mxu1 %v4341_v59  ;;  %v4032_v59 = vpack.c.bf16 %v2969_v58, %v2968_v56 }
 0x5fa   :  { %2517 = vmatprep.subr.bf16.mxu1 %v4346_v60  ;;  %v2971_v60 = vld [vmem:[%s5456_s22 + $0x38] sm:$0xff] }
 0x5fd   :  { %2518 = vmatpush1.bf16.msra.mxu1 %v4344_v61 }
 0x5fe   :  { %2519 = vmatprep.subr.bf16.mxu1 %v4349_v62  ;;  %v2972_v62 = vld [vmem:[%s5456_s22 + $0x40] sm:$0xff] }
 0x601   :  { %2520 = vmatpush1.bf16.msra.mxu1 %v4347_v0  ;;  %v4038_v0 = vpack.c.bf16 %v2973_v63, %v2972_v62 }
 0x602   :  { %4025 = vmatprep.subr.bf16.mxu1 %v4404_v19 }
 0x604   :  { %2538 = vmatmul.mubr.bf16.vlgmr.msra.gmra.mrb[12].mxu1 %v2424_v4  ;;  %v4041_v4 = vpack.c.bf16 %v2975_v3, %v2974_v1 }
 0x605   :  { %4022 = vmatprep.mubr.msk.f32.mxu1 %vm4403_vm0, %v4401_v2  ;;  %4027 = vmatpush3.bf16.msra.mxu1 %v4026_v20  ;;  %v3527_v20 = vld [vmem:[%s5455_s21] ss:$0 sm:$0xff] }
 0x606   :  { %4028 = vmatprep.subr.bf16.mxu1 %v4404_v19 }
 0x609   :  { %4030 = vmatpush3.bf16.msra.mxu1 %v4029_v22 }
 0x60a   :  { %4031 = vmatprep.subr.bf16.mxu1 %v4404_v19 }
 0x60d   :  { %4033 = vmatpush3.bf16.msra.mxu1 %v4032_v59 }
 0x60e   :  { %4034 = vmatprep.subr.bf16.mxu1 %v4404_v19 }
 0x6d7   :  { %v2539_v27 = vpop.f32.mrb[12].mxu1 }
 0x6d8   :  { %v2560_v16 = vmul.f32 %v2553_v25, %v2539_v27  ;;  %v2541_v17 = vpop.f32.mrb[13].mxu1 }
 0x6d9   :  { %v2561_v29 = vmul.f32 %v2557_v26, %v2541_v17  ;;  %v2543_v30 = vpop.f32.mrb[14].mxu1 }
 0x6da   :  { %v2574_v31 = vadd.f32 %v2567_v12, %v2560_v16  ;;  %v2544_v28 = vpop.f32.mrb[15].mxu1 }
 0x6db   :  { %v2575_v32 = vadd.f32 %v2571_v14, %v2561_v29 }
 0x6dd   :  { %v5297_v33 = vcombine.low %v2574_v31, %v2575_v32  ;;  %v5299_v34 = vcombine.high %v2574_v31, %v2575_v32 }
 0x6df   :  { %v2582_v35 = vmax.f32 %v5297_v33, 0.0  ;;  %v2583_v36 = vmax.f32 %v5299_v34, 0.0  ;;  %v2941_v25 = vrot.slane %v5297_v33, 4  ;;  %v2942_v12 = vrot.slane %v5299_v34, 4 }
 0x6e1   :  { %2584 = vst [vmem:[#allocation4 + $0x1] sm:$0xf] %v2582_v35  ;;  %2585 = vst [vmem:[#allocation4 + $0x9] sm:$0xf] %v2583_v36 }
 0x6e8   :  { %v4358_v13 = vld [vmem:[#allocation4 + $0x1] ss:$8 sps:$4 sm:$0xff]  }
 0x6e9   :  { %v2632_v37 = vpack.c.bf16 %v4358_v13, %v4358_v13  ;;  %v4367_v45 = vld [vmem:[#allocation4] ss:$8 sps:$4 sm:$0xff]  }
 0x6ea   :  { %v2608_v47 = vpack.c.bf16 %v4367_v45, %v4367_v45  ;;  %v4376_v57 = vld [vmem:[#allocation4 + $0x2] ss:$8 sps:$4 sm:$0xff]  }
 0x6eb   :  { %3947 = vmatmul.mubr.bf16.vlgmr.msra.gmra.mrb[12].mxu0 %v2632_v37  ;;  %v2832_v55 = vpack.c.bf16 %v4376_v57, %v4376_v57 }
 0x6ec   :  { %3951 = vmatpush3.bf16.msra.mxu0 %v4359_v18  ;;  %3966 = vmatprep.mubr.msk.bf16.mxu0 %vm4403_vm0, %v4401_v2 }
 0x6ed   :  { %3952 = vmatprep.subr.bf16.mxu0 %v4401_v2 }
 0x6f0   :  { %3953 = vmatpush3.bf16.msra.mxu0 %v4360_v38 }
 0x6f1   :  { %3954 = vmatprep.subr.bf16.mxu0 %v4401_v2 }
 0x6f4   :  { %3955 = vmatpush3.bf16.msra.mxu0 %v4361_v39 }
 0x6f5   :  { %3956 = vmatprep.subr.bf16.mxu0 %v4401_v2 }
 0x6f8   :  { %3957 = vmatpush3.bf16.msra.mxu0 %v4362_v40 }
 0x6f9   :  { %3958 = vmatprep.subr.bf16.mxu0 %v4401_v2 }
 0x6fc   :  { %3959 = vmatpush3.bf16.msra.mxu0 %v4363_v41  ;;  %v3528_v41 = vld [vmem:[%s5457_s23] ss:$0 sm:$0xff] }
 0x6fd   :  { %3960 = vmatprep.subr.bf16.mxu0 %v4401_v2 }
 0x700   :  { %3961 = vmatpush3.bf16.msra.mxu0 %v4364_v42 }
 0x701   :  { %3962 = vmatprep.subr.bf16.mxu0 %v4401_v2 }
 0x704   :  { %3963 = vmatpush3.bf16.msra.mxu0 %v4365_v43 }
 0x705   :  { %3964 = vmatprep.subr.bf16.mxu0 %v4401_v2 }
 0x708   :  { %3965 = vmatpush3.bf16.msra.mxu0 %v4366_v44 }
 0x709   :  { %3970 = vmatprep.subr.bf16.mxu0 %v4401_v2 }
 0x70b   :  { %3967 = vmatmul.mubr.bf16.vlgmr.msra.gmra.mrb[12].mxu0 %v2608_v47 }
 0x70c   :  { %3971 = vmatpush3.bf16.msra.mxu0 %v4368_v46  ;;  %3986 = vmatprep.mubr.msk.bf16.mxu0 %vm4403_vm0, %v4401_v2 }
 0x70d   :  { %3972 = vmatprep.subr.bf16.mxu0 %v4401_v2 }
 0x710   :  { %3973 = vmatpush3.bf16.msra.mxu0 %v4369_v48 }
 0x711   :  { %3974 = vmatprep.subr.bf16.mxu0 %v4401_v2 }
 0x714   :  { %3975 = vmatpush3.bf16.msra.mxu0 %v4370_v49 }
 0x715   :  { %3976 = vmatprep.subr.bf16.mxu0 %v4401_v2 }
 0x718   :  { %3977 = vmatpush3.bf16.msra.mxu0 %v4371_v50 }
 0x719   :  { %3978 = vmatprep.subr.bf16.mxu0 %v4401_v2 }
 0x71c   :  { %3979 = vmatpush3.bf16.msra.mxu0 %v4372_v51 }
 0x71d   :  { %3980 = vmatprep.subr.bf16.mxu0 %v4401_v2 }
 0x720   :  { %3981 = vmatpush3.bf16.msra.mxu0 %v4373_v52 }
 0x721   :  { %3982 = vmatprep.subr.bf16.mxu0 %v4401_v2 }
 0x724   :  { %3983 = vmatpush3.bf16.msra.mxu0 %v4374_v53 }
 0x725   :  { %3984 = vmatprep.subr.bf16.mxu0 %v4401_v2  ;;  %v2970_v2 = vld [vmem:[%s5456_s22 + $0x30] sm:$0xff]  ;;  %s4405_s22 = smov [#allocation5]  }
 0x726   :  { %v4035_v61 = vpack.c.bf16 %v2971_v60, %v2970_v2  ;;  %s3070_s15 = sshll.u32 %s4405_s22, 4  ;;  %s3071_s15 = int_to_ptr.vmem [resolvable:$true] %s3070_s15 }
 0x727   :  { %s4377_s27 = scalar_lea.vmem %s3071_s15, 32  ;;  %p4382_p1 = scmp.lt.s32.totalorder %s3071_s15, %s3071_s15 }
 0x728   :  { %3985 = vmatpush3.bf16.msra.mxu0 %v4375_v54  ;;  %4036 = vmatpush3.bf16.msra.mxu1 %v4035_v61  ;;  %p4378_p0 = scmp.ne.s32.totalorder %s3071_s15, %s4377_s27  ;;  %p4383_p2 = scmp.lt.s32.totalorder %s4377_s27, %s4377_s27 }
 0x729   :  { %4037 = vmatprep.subr.bf16.mxu1 %v4404_v19 }
 0x72a   :  { %p4384_p3 = por %p4383_p2, %p4382_p1 }
 0x72b   :  { %3987 = vmatmul.mubr.bf16.vlgmr.msra.gmra.mrb[12].mxu0 %v2832_v55 }
 0x72c   :  { %4039 = vmatpush3.bf16.msra.mxu1 %v4038_v0  ;;  %p4385_p4 = pnand %p4384_p3, %p4378_p0 }
 0x72d   :  { %4040 = vmatprep.subr.bf16.mxu1 %v4404_v19 }
 0x730   :  { %4042 = vmatpush3.bf16.msra.mxu1 %v4041_v4 }
 0x731   :  { %4043 = vmatprep.subr.bf16.mxu1 %v4404_v19 }
 0x734   :  { %4045 = vmatpush3.bf16.msra.mxu1 %v4044_v7 }
 0x735   :  { %4046 = vmatprep.subr.bf16.mxu1 %v4404_v19 }
 0x738   :  { %4048 = vmatpush3.bf16.msra.mxu1 %v4047_v10 }
 0x7fe   :  { %v2915_v15 = vpop.f32.mrb[12].mxu0 }
 0x7ff   :  { %v2929_v21 = vmul.f32 %v3526_v11, %v2915_v15  ;;  %v3988_v22 = vpop.f32.mrb[13].mxu0 }
 0x800   :  { %v2918_v23 = vpop.f32.mrb[14].mxu0 }
 0x801   :  { %v2937_v24 = vadd.f32 %v3527_v20, %v2929_v21  ;;  %v3989_v26 = vpop.f32.mrb[15].mxu0 }
 0x803   :  { %v2939_v19 = vcombine.high %v2937_v24, %v2937_v24  ;;  %v2945_v27 = vadd.f32 %v2941_v25, %v2937_v24 }
 0x805   :  { %v2946_v14 = vadd.f32 %v2942_v12, %v2939_v19  ;;  %v2947_v16 = vmax.f32 %v2945_v27, 0.0 }
 0x807   :  { %v2948_v17 = vmax.f32 %v2946_v14, 0.0  ;;  %v2950_v29 = vsel %vm2949_vm1, %v2947_v16, 0.0 }
 0x808   :  { %v2951_v30 = vrot.slane %v2950_v29, 4 }
 0x809   :  { %v2957_v31 = vsel %vm2949_vm1, %v2948_v17, 0.0 }
 0x80a   :  { %v2952_v28 = vadd.f32 %v2951_v30, %v2950_v29  ;;  %v2958_v32 = vrot.slane %v2957_v31, 4 }
 0x80c   :  { %v2953_v35 = vrot.slane %v2952_v28, 2  ;;  %v2959_v36 = vadd.f32 %v2958_v32, %v2957_v31 }
 0x80e   :  { %v2954_v13 = vadd.f32 %v2953_v35, %v2952_v28  ;;  %v2960_v18 = vrot.slane %v2959_v36, 2 }
 0x810   :  { %v2955_v37 = vrot.slane %v2954_v13, 1  ;;  %v2961_v33 = vadd.f32 %v2960_v18, %v2959_v36 }
 0x812   :  { %v2962_v38 = vrot.slane %v2961_v33, 1  ;;  %v2956_v34 = vadd.f32 %v2955_v37, %v2954_v13 }
 0x814   :  { %v2963_v39 = vadd.f32 %v2962_v38, %v2961_v33 }
 0x816   :  { %v2990_v40 = vsel %vm2989_vm2, %v2963_v39, %v2956_v34 }
 0x817   :  { %4023 = vmatmul.mubr.f32.vlgmr.msra.gmra.mrb[16].mxu1 %v2990_v40 }
 0x8ea   :  { %v3058_v42 = vpop.f32.mrb[16].mxu1 }
 0x8eb   :  { %v3059_v43 = vadd.f32 %v3528_v41, %v3058_v42  ;;  %v4024_v44 = vpop.f32.mrb[17].mxu1 }
 0x8ed   :  { %3063 = vst.msk [vmem:[#allocation5] sm:$0x3] %vm3062_vm3, %v3059_v43 }
 0x8ee   :  { %4388 = shalt.err (!%p4385_p4)
}
 0x8ef   :  { %s4389_s1 = scalar_lea.hbm %s5458_s24, 32 }
 0x8f0   :  { %p4390_p5 = scmp.ne.s32.totalorder %s5458_s24, %s4389_s1  ;;  %p4393_p6 = scmp.lt.u32.totalorder %s4389_s1, %s5458_s24 }
 0x8f2   :  { %p4395_p7 = pnand %p4393_p6, %p4390_p5 }
 0x8f4   :  { %4398 = shalt.err (!%p4395_p7)
}
 0x8f5   :  { %3073 = dma.vmem_to_hbm [thread:$0]  %s3071_s15, 32, %s5458_s24, [#allocation6]  }
 0x8f6   :  { %4399 = dma.done.wait [#allocation6], 32  }
 0x8f7   :  { %4400 = vsyncadd [#allocation6], 4294967264 }
 0x8f8   :  { %3077 = vsyncpa [#allocation6], 1 }

</bundles_post_ra>
